<compile_context>
chip_gen: v6e
topology: v6e:2x2x1
jax: 0.10.0
libtpu: 0.0.40
codegen_flags: <defaults>
</compile_context>

<pallas_src>
import functools

import jax
import jax.numpy as jnp
from jax.experimental import pallas as pl
from jax.experimental.pallas import tpu as pltpu

HIDDEN = 768
NEG_SLOPE = 0.01        # nn.LeakyReLU() default negative_slope
LANE = 128
SUBLANE = 8


def _leaky_relu(x):
    return jnp.where(x >= 0, x, NEG_SLOPE * x)


def _round_up(x, m):
    return (x + m - 1) // m * m


def nonlinear_kernel(x_ref, mask_ref,
                     w1_ref, b1_ref,
                     w2_ref, b2_ref,
                     w3_ref, b3_ref,
                     out_ref, *, apply_dropout):
    # x: (bm, 768) f32 -> bf16 for the MXU; weights already bf16; accumulate in f32.
    x = x_ref[...].astype(jnp.bfloat16)

    # ---- linear1 + LeakyReLU ----
    h1 = _leaky_relu(
        jnp.dot(x, w1_ref[...], preferred_element_type=jnp.float32) + b1_ref[...]
    )

    # ---- dropout (mask precomputed in wrapper: 0 or 1/(1-p)) ----
    if apply_dropout:
        h1 = h1 * mask_ref[...]

    # ---- linear2 + LeakyReLU ----
    h2 = _leaky_relu(
        jnp.dot(h1.astype(jnp.bfloat16), w2_ref[...],
                preferred_element_type=jnp.float32) + b2_ref[...]
    )

    # ---- linear3 + LeakyReLU (n_class padded to a full lane width) ----
    h3 = _leaky_relu(
        jnp.dot(h2.astype(jnp.bfloat16), w3_ref[...],
                preferred_element_type=jnp.float32) + b3_ref[...]
    )

    out_ref[...] = h3.astype(out_ref.dtype)


def nonlinear_forward(pooled, params, *, key=None, dropout_rate=0.1, training=True):
    """pooled: (B, 768) f32. params = (w1, b1, w2, b2, w3, b3); biases are (1, dim)."""
    w1, b1, w2, b2, w3, b3 = params
    B, H = pooled.shape
    n_class = w3.shape[1]

    # --- pad n_class up to one full lane width (lane-dense output stores) ---
    npad = _round_up(max(n_class, LANE), LANE)
    w3p = jnp.zeros((H, npad), jnp.float32).at[:, :n_class].set(w3.astype(jnp.float32))
    b3p = jnp.zeros((1, npad), jnp.float32).at[:, :n_class].set(b3.astype(jnp.float32))

    # --- bf16 weights in HBM (halves memory-bound weight DMA), f32 biases ---
    w1b = w1.astype(jnp.bfloat16)
    w2b = w2.astype(jnp.bfloat16)
    w3b = w3p.astype(jnp.bfloat16)
    b1f = b1.astype(jnp.float32)
    b2f = b2.astype(jnp.float32)
    b3f = b3p.astype(jnp.float32)

    # --- pad batch to a sublane multiple and pick a batch tile ---
    Bp = _round_up(B, SUBLANE)
    if Bp > 128:
        Bp = _round_up(B, 128)
        bm = 128
    else:
        bm = Bp
    xp = jnp.zeros((Bp, H), jnp.float32).at[:B].set(pooled.astype(jnp.float32))

    # --- inverted-dropout mask built in the wrapper (portable, per-row unique) ---
    apply_dropout = bool(training) and float(dropout_rate) > 0.0
    if apply_dropout:
        if key is None:
            key = jax.random.PRNGKey(0)
        keep = jax.random.bernoulli(key, 1.0 - float(dropout_rate), (Bp, H))
        mask = keep.astype(jnp.float32) * jnp.float32(1.0 / (1.0 - float(dropout_rate)))
    else:
        mask = jnp.ones((Bp, H), jnp.float32)

    kernel = functools.partial(nonlinear_kernel, apply_dropout=apply_dropout)

    out = pl.pallas_call(
        kernel,
        out_shape=jax.ShapeDtypeStruct((Bp, npad), jnp.float32),
        grid=(Bp // bm,),
        in_specs=[
            pl.BlockSpec((bm, H), lambda i: (i, 0)),     # pooled tile
            pl.BlockSpec((bm, H), lambda i: (i, 0)),     # dropout mask tile
            pl.BlockSpec((H, H), lambda i: (0, 0)),      # w1 (bf16)
            pl.BlockSpec((1, H), lambda i: (0, 0)),      # b1
            pl.BlockSpec((H, H), lambda i: (0, 0)),      # w2 (bf16)
            pl.BlockSpec((1, H), lambda i: (0, 0)),      # b2
            pl.BlockSpec((H, npad), lambda i: (0, 0)),   # w3 padded (bf16)
            pl.BlockSpec((1, npad), lambda i: (0, 0)),   # b3 padded
        ],
        out_specs=pl.BlockSpec((bm, npad), lambda i: (i, 0)),
        compiler_params=pltpu.CompilerParams(
            dimension_semantics=("parallel",),           # batch tiles split across TCs
            vmem_limit_bytes=32 * 1024 * 1024,
        ),
    )(xp, mask, w1b, b1f, w2b, b2f, w3b, b3f)

    return out[:B, :n_class]


def _init_params(key, n_class):
    """Synthetic params matching nn.Linear(768,768) x2 + nn.Linear(768,n_class)."""
    ks = jax.random.split(key, 6)
    scale = 0.02
    w1 = scale * jax.random.normal(ks[0], (HIDDEN, HIDDEN), jnp.float32)
    b1 = scale * jax.random.normal(ks[1], (1, HIDDEN), jnp.float32)
    w2 = scale * jax.random.normal(ks[2], (HIDDEN, HIDDEN), jnp.float32)
    b2 = scale * jax.random.normal(ks[3], (1, HIDDEN), jnp.float32)
    w3 = scale * jax.random.normal(ks[4], (HIDDEN, n_class), jnp.float32)
    b3 = scale * jax.random.normal(ks[5], (1, n_class), jnp.float32)
    return (w1, b1, w2, b2, w3, b3)


def _ref_forward_bf16(pooled, params):
    """Pure-JAX reference with the same bf16-weight / f32-accumulate recipe."""
    w1, b1, w2, b2, w3, b3 = params
    lrelu = lambda x: jnp.where(x >= 0, x, NEG_SLOPE * x)
    h1 = lrelu(jnp.dot(pooled.astype(jnp.bfloat16), w1.astype(jnp.bfloat16),
                       preferred_element_type=jnp.float32) + b1)
    h2 = lrelu(jnp.dot(h1.astype(jnp.bfloat16), w2.astype(jnp.bfloat16),
                       preferred_element_type=jnp.float32) + b2)
    h3 = lrelu(jnp.dot(h2.astype(jnp.bfloat16), w3.astype(jnp.bfloat16),
                       preferred_element_type=jnp.float32) + b3)
    return h3


if __name__ == "__main__":
    key = jax.random.PRNGKey(0)
    k_pooled, k_params, k_drop = jax.random.split(key, 3)

    B = 8            # batch of sentences
    n_class = 4
    dropout_rate = 0.1

    # Synthetic pooled_output standing in for the BERT encoder output.
    pooled = jax.random.normal(k_pooled, (B, HIDDEN), jnp.float32)
    params = _init_params(k_params, n_class)

    # Training-mode call (dropout active).
    out_train = nonlinear_forward(pooled, params, key=k_drop,
                                  dropout_rate=dropout_rate, training=True)
    out_train = jax.block_until_ready(out_train)
    assert out_train.shape == (B, n_class), out_train.shape
    assert out_train.dtype == jnp.float32
    assert bool(jnp.all(jnp.isfinite(out_train)))

    # Eval-mode call (deterministic) cross-checked against a pure-JAX reference.
    out_eval = nonlinear_forward(pooled, params,
                                 dropout_rate=dropout_rate, training=False)
    out_eval = jax.block_until_ready(out_eval)
    ref = _ref_forward_bf16(pooled, params)
    assert out_eval.shape == (B, n_class)
    assert jnp.allclose(out_eval, ref, atol=2e-2, rtol=2e-2), (
        float(jnp.max(jnp.abs(out_eval - ref))))

    print("KERNEL_OK")
</pallas_src>

<mosaic_0001>
module attributes {stable_mosaic.version = 11 : i64} {
  func.func @nonlinear_kernel(%arg0: i32, %arg1: memref<8x768xf32, #tpu.memory_space<vmem>>, %arg2: memref<8x768xf32, #tpu.memory_space<vmem>>, %arg3: memref<768x768xbf16, #tpu.memory_space<vmem>>, %arg4: memref<1x768xf32, #tpu.memory_space<vmem>>, %arg5: memref<768x768xbf16, #tpu.memory_space<vmem>>, %arg6: memref<1x768xf32, #tpu.memory_space<vmem>>, %arg7: memref<768x128xbf16, #tpu.memory_space<vmem>>, %arg8: memref<1x128xf32, #tpu.memory_space<vmem>>, %arg9: memref<8x128xf32, #tpu.memory_space<vmem>>) attributes {dimension_semantics = [#tpu.dimension_semantics<parallel>], iteration_bounds = array<i64: 1>, scalar_prefetch = 0 : i64, scratch_operands = 0 : i64, tpu.core_type = #tpu.core_type<tc>, window_params = [{transform_indices = @transform_0, window_bounds = array<i64: 8, 768>}, {transform_indices = @transform_1, window_bounds = array<i64: 8, 768>}, {pipeline_mode = #tpu.pipeline_mode<synchronous>, transform_indices = @transform_2, window_bounds = array<i64: 768, 768>}, {pipeline_mode = #tpu.pipeline_mode<synchronous>, transform_indices = @transform_3, window_bounds = array<i64: 1, 768>}, {pipeline_mode = #tpu.pipeline_mode<synchronous>, transform_indices = @transform_4, window_bounds = array<i64: 768, 768>}, {pipeline_mode = #tpu.pipeline_mode<synchronous>, transform_indices = @transform_5, window_bounds = array<i64: 1, 768>}, {pipeline_mode = #tpu.pipeline_mode<synchronous>, transform_indices = @transform_6, window_bounds = array<i64: 768, 128>}, {pipeline_mode = #tpu.pipeline_mode<synchronous>, transform_indices = @transform_7, window_bounds = array<i64: 1, 128>}, {transform_indices = @transform_8, window_bounds = array<i64: 8, 128>}]} {
    %c0 = arith.constant 0 : index
    %c0_0 = arith.constant 0 : index
    %0 = vector.load %arg1[%c0, %c0_0] : memref<8x768xf32, #tpu.memory_space<vmem>>, vector<8x768xf32>
    %1 = arith.truncf %0 : vector<8x768xf32> to vector<8x768xbf16>
    %c0_1 = arith.constant 0 : index
    %c0_2 = arith.constant 0 : index
    %2 = vector.load %arg3[%c0_1, %c0_2] : memref<768x768xbf16, #tpu.memory_space<vmem>>, vector<768x768xbf16>
    %cst = arith.constant dense<0.000000e+00> : vector<8x768xf32>
    %3 = tpu.matmul %1, %2, %cst {dimension_numbers = #tpu.dot_dimension_numbers<[1], [0], [0], [1], [0, 0, 1, 1], [], []>} : vector<8x768xbf16>, vector<768x768xbf16>, vector<8x768xf32> -> vector<8x768xf32>
    %c0_3 = arith.constant 0 : index
    %c0_4 = arith.constant 0 : index
    %4 = vector.load %arg4[%c0_3, %c0_4] : memref<1x768xf32, #tpu.memory_space<vmem>>, vector<1x768xf32>
    %5 = vector.broadcast %4 : vector<1x768xf32> to vector<8x768xf32>
    %6 = arith.addf %3, %5 : vector<8x768xf32>
    %cst_5 = arith.constant 0.000000e+00 : f32
    %7 = vector.broadcast %cst_5 : f32 to vector<8x768xf32>
    %8 = arith.cmpf oge, %6, %7 : vector<8x768xf32>
    %cst_6 = arith.constant 0.00999999977 : f32
    %9 = vector.broadcast %cst_6 : f32 to vector<8x768xf32>
    %10 = arith.mulf %9, %6 : vector<8x768xf32>
    %11 = arith.select %8, %6, %10 : vector<8x768xi1>, vector<8x768xf32>
    %c0_7 = arith.constant 0 : index
    %c0_8 = arith.constant 0 : index
    %12 = vector.load %arg2[%c0_7, %c0_8] : memref<8x768xf32, #tpu.memory_space<vmem>>, vector<8x768xf32>
    %13 = arith.mulf %11, %12 : vector<8x768xf32>
    %14 = arith.truncf %13 : vector<8x768xf32> to vector<8x768xbf16>
    %c0_9 = arith.constant 0 : index
    %c0_10 = arith.constant 0 : index
    %15 = vector.load %arg5[%c0_9, %c0_10] : memref<768x768xbf16, #tpu.memory_space<vmem>>, vector<768x768xbf16>
    %cst_11 = arith.constant dense<0.000000e+00> : vector<8x768xf32>
    %16 = tpu.matmul %14, %15, %cst_11 {dimension_numbers = #tpu.dot_dimension_numbers<[1], [0], [0], [1], [0, 0, 1, 1], [], []>} : vector<8x768xbf16>, vector<768x768xbf16>, vector<8x768xf32> -> vector<8x768xf32>
    %c0_12 = arith.constant 0 : index
    %c0_13 = arith.constant 0 : index
    %17 = vector.load %arg6[%c0_12, %c0_13] : memref<1x768xf32, #tpu.memory_space<vmem>>, vector<1x768xf32>
    %18 = vector.broadcast %17 : vector<1x768xf32> to vector<8x768xf32>
    %19 = arith.addf %16, %18 : vector<8x768xf32>
    %cst_14 = arith.constant 0.000000e+00 : f32
    %20 = vector.broadcast %cst_14 : f32 to vector<8x768xf32>
    %21 = arith.cmpf oge, %19, %20 : vector<8x768xf32>
    %cst_15 = arith.constant 0.00999999977 : f32
    %22 = vector.broadcast %cst_15 : f32 to vector<8x768xf32>
    %23 = arith.mulf %22, %19 : vector<8x768xf32>
    %24 = arith.select %21, %19, %23 : vector<8x768xi1>, vector<8x768xf32>
    %25 = arith.truncf %24 : vector<8x768xf32> to vector<8x768xbf16>
    %c0_16 = arith.constant 0 : index
    %c0_17 = arith.constant 0 : index
    %26 = vector.load %arg7[%c0_16, %c0_17] : memref<768x128xbf16, #tpu.memory_space<vmem>>, vector<768x128xbf16>
    %cst_18 = arith.constant dense<0.000000e+00> : vector<8x128xf32>
    %27 = tpu.matmul %25, %26, %cst_18 {dimension_numbers = #tpu.dot_dimension_numbers<[1], [0], [0], [1], [0, 0, 1, 1], [], []>} : vector<8x768xbf16>, vector<768x128xbf16>, vector<8x128xf32> -> vector<8x128xf32>
    %c0_19 = arith.constant 0 : index
    %c0_20 = arith.constant 0 : index
    %28 = vector.load %arg8[%c0_19, %c0_20] : memref<1x128xf32, #tpu.memory_space<vmem>>, vector<1x128xf32>
    %29 = vector.broadcast %28 : vector<1x128xf32> to vector<8x128xf32>
    %30 = arith.addf %27, %29 : vector<8x128xf32>
    %cst_21 = arith.constant 0.000000e+00 : f32
    %31 = vector.broadcast %cst_21 : f32 to vector<8x128xf32>
    %32 = arith.cmpf oge, %30, %31 : vector<8x128xf32>
    %cst_22 = arith.constant 0.00999999977 : f32
    %33 = vector.broadcast %cst_22 : f32 to vector<8x128xf32>
    %34 = arith.mulf %33, %30 : vector<8x128xf32>
    %35 = arith.select %32, %30, %34 : vector<8x128xi1>, vector<8x128xf32>
    %c0_23 = arith.constant 0 : index
    %c0_24 = arith.constant 0 : index
    %36 = vector.load %arg9[%c0_23, %c0_24] : memref<8x128xf32, #tpu.memory_space<vmem>>, vector<8x128xf32>
    tpu.vector_store %arg9[%c0_23, %c0_24], %35 {strides = array<i32>} : memref<8x128xf32, #tpu.memory_space<vmem>>, vector<8x128xf32>,
    return
  }
  func.func @transform_0(%arg0: i32) -> (i32, i32) {
    %c0_i32 = arith.constant 0 : i32
    %c0_i32_0 = arith.constant 0 : i32
    return %arg0, %c0_i32 : i32, i32
  }
  func.func @transform_1(%arg0: i32) -> (i32, i32) {
    %c0_i32 = arith.constant 0 : i32
    %c0_i32_0 = arith.constant 0 : i32
    return %arg0, %c0_i32 : i32, i32
  }
  func.func @transform_2(%arg0: i32) -> (i32, i32) {
    %c0_i32 = arith.constant 0 : i32
    %c0_i32_0 = arith.constant 0 : i32
    %c0_i32_1 = arith.constant 0 : i32
    return %c0_i32, %c0_i32_0 : i32, i32
  }
  func.func @transform_3(%arg0: i32) -> (i32, i32) {
    %c0_i32 = arith.constant 0 : i32
    %c0_i32_0 = arith.constant 0 : i32
    %c0_i32_1 = arith.constant 0 : i32
    return %c0_i32, %c0_i32_0 : i32, i32
  }
  func.func @transform_4(%arg0: i32) -> (i32, i32) {
    %c0_i32 = arith.constant 0 : i32
    %c0_i32_0 = arith.constant 0 : i32
    %c0_i32_1 = arith.constant 0 : i32
    return %c0_i32, %c0_i32_0 : i32, i32
  }
  func.func @transform_5(%arg0: i32) -> (i32, i32) {
    %c0_i32 = arith.constant 0 : i32
    %c0_i32_0 = arith.constant 0 : i32
    %c0_i32_1 = arith.constant 0 : i32
    return %c0_i32, %c0_i32_0 : i32, i32
  }
  func.func @transform_6(%arg0: i32) -> (i32, i32) {
    %c0_i32 = arith.constant 0 : i32
    %c0_i32_0 = arith.constant 0 : i32
    %c0_i32_1 = arith.constant 0 : i32
    return %c0_i32, %c0_i32_0 : i32, i32
  }
  func.func @transform_7(%arg0: i32) -> (i32, i32) {
    %c0_i32 = arith.constant 0 : i32
    %c0_i32_0 = arith.constant 0 : i32
    %c0_i32_1 = arith.constant 0 : i32
    return %c0_i32, %c0_i32_0 : i32, i32
  }
  func.func @transform_8(%arg0: i32) -> (i32, i32) {
    %c0_i32 = arith.constant 0 : i32
    %c0_i32_0 = arith.constant 0 : i32
    return %arg0, %c0_i32 : i32, i32
  }
}

</mosaic_0001>

<bundles_post_ra>
// kernel: tpu_custom_call.1
= control target key start
LH: loop header
LB: loop body
LE: loop exit
PB: predicated region body
PF: predicated region fallthrough
CT: control target
= control target key end

     0   :  { %13 = vsyncpa [#allocation3], 0  ;;  %s7049_s0 = inlined_call_operand.hbm [shape: f32[8,768], index: 0, kind: input, shape index: {}]   ;;  %s7050_s1 = inlined_call_operand.hbm [shape: f32[8,768], index: 1, kind: input, shape index: {}]   ;;  %s7051_s2 = inlined_call_operand.hbm [shape: bf16[768,768], index: 2, kind: input, shape index: {}]   ;;  %s7052_s3 = inlined_call_operand.hbm [shape: f32[1,768], index: 3, kind: input, shape index: {}]   ;;  %s7053_s4 = inlined_call_operand.hbm [shape: bf16[768,768], index: 4, kind: input, shape index: {}]   ;;  %s7054_s5 = inlined_call_operand.hbm [shape: f32[1,768], index: 5, kind: input, shape index: {}]   ;;  %s7055_s6 = inlined_call_operand.hbm [shape: bf16[768,128], index: 6, kind: input, shape index: {}]   ;;  %s7056_s7 = inlined_call_operand.hbm [shape: f32[1,128], index: 7, kind: input, shape index: {}]   ;;  %s7057_s8 = inlined_call_operand.hbm [shape: f32[8,128], index: 8, kind: output, shape index: {}]  }
   0x1   :  { %14 = vsyncpa [#allocation6], 0 }
   0x2   :  { %15 = vsyncpa [#allocation9], 0 }
   0x3   :  { %16 = vsyncpa [#allocation12], 0 }
   0x4   :  { %17 = vsyncpa [#allocation15], 0 }
   0x5   :  { %18 = vsyncpa [#allocation4], 0  ;;  %s6802_s27 = smov [#allocation5]   ;;  %s6803_s29 = smov [#allocation8]  }
   0x6   :  { %s35_s28 = sshll.u32 %s6802_s27, 4  ;;  %s57_s30 = sshll.u32 %s6803_s29, 4  ;;  %s36_s28 = int_to_ptr.vmem [resolvable:$true] %s35_s28  ;;  %s58_s30 = int_to_ptr.vmem [resolvable:$true] %s57_s30 }
   0x7   :  { %s6618_s9 = scalar_lea.vmem %s36_s28, 768  ;;  %p6623_p1 = scmp.lt.s32.totalorder %s36_s28, %s36_s28 }
   0x8   :  { %p6619_p0 = scmp.ne.s32.totalorder %s36_s28, %s6618_s9  ;;  %p6624_p2 = scmp.lt.s32.totalorder %s6618_s9, %s6618_s9 }
   0xa   :  { %p6625_p3 = por %p6624_p2, %p6623_p1 }
   0xc   :  { %p6626_p4 = pnand %p6625_p3, %p6619_p0 }
   0xe   :  { %6629 = shalt.err (!%p6626_p4)
}
   0xf   :  { %38 = dma.hbm_to_vmem [thread:$0]  %s7050_s1, 768, %s36_s28, [#allocation6]  }
  0x10   :  { %s6638_s12 = scalar_lea.vmem %s58_s30, 96  ;;  %p6643_p6 = scmp.lt.s32.totalorder %s58_s30, %s58_s30 }
  0x11   :  { %p6639_p5 = scmp.ne.s32.totalorder %s58_s30, %s6638_s12  ;;  %p6644_p7 = scmp.lt.s32.totalorder %s6638_s12, %s6638_s12 }
  0x13   :  { %p6645_p8 = por %p6644_p7, %p6643_p6 }
  0x15   :  { %p6646_p9 = pnand %p6645_p8, %p6639_p5 }
  0x17   :  { %6649 = shalt.err (!%p6646_p9)
}
  0x18   :  { %60 = dma.hbm_to_vmem [thread:$0]  %s7052_s3, 96, %s58_s30, [#allocation9]  }
  0x19   :  { %s6804_s15 = smov [#allocation11]   ;;  %s6805_s17 = smov [#allocation2]  }
  0x1a   :  { %s79_s16 = sshll.u32 %s6804_s15, 4  ;;  %s25_s18 = sshll.u32 %s6805_s17, 4  ;;  %s80_s16 = int_to_ptr.vmem [resolvable:$true] %s79_s16  ;;  %s26_s18 = int_to_ptr.vmem [resolvable:$true] %s25_s18 }
  0x1b   :  { %s6658_s19 = scalar_lea.vmem %s80_s16, 96  ;;  %p6663_p11 = scmp.lt.s32.totalorder %s80_s16, %s80_s16 }
  0x1c   :  { %p6659_p10 = scmp.ne.s32.totalorder %s80_s16, %s6658_s19  ;;  %p6664_p12 = scmp.lt.s32.totalorder %s6658_s19, %s6658_s19 }
  0x1e   :  { %p6665_p13 = por %p6664_p12, %p6663_p11 }
  0x20   :  { %p6666_p0 = pnand %p6665_p13, %p6659_p10 }
  0x22   :  { %6669 = shalt.err (!%p6666_p0)
}
  0x23   :  { %82 = dma.hbm_to_vmem [thread:$0]  %s7054_s5, 96, %s80_s16, [#allocation12]  }
  0x24   :  { %s6678_s21 = scalar_lea.vmem %s26_s18, 768  ;;  %p6683_p2 = scmp.lt.s32.totalorder %s26_s18, %s26_s18 }
  0x25   :  { %p6679_p1 = scmp.ne.s32.totalorder %s26_s18, %s6678_s21  ;;  %p6684_p3 = scmp.lt.s32.totalorder %s6678_s21, %s6678_s21 }
  0x27   :  { %p6685_p4 = por %p6684_p3, %p6683_p2 }
  0x29   :  { %p6686_p5 = pnand %p6685_p4, %p6679_p1 }
  0x2b   :  { %6689 = shalt.err (!%p6686_p5)
}
  0x2c   :  { %28 = dma.hbm_to_vmem [thread:$0]  %s7049_s0, 768, %s26_s18, [#allocation3]  }
  0x2d   :  { %s6806_s23 = smov [#allocation7]  }
  0x2e   :  { %s44_s24 = sshll.u32 %s6806_s23, 4  ;;  %s45_s24 = int_to_ptr.vmem [resolvable:$true] %s44_s24 }
  0x2f   :  { %s6698_s25 = scalar_lea.vmem %s45_s24, 36864  ;;  %p6703_p7 = scmp.lt.s32.totalorder %s45_s24, %s45_s24 }
  0x30   :  { %p6699_p6 = scmp.ne.s32.totalorder %s45_s24, %s6698_s25  ;;  %p6704_p8 = scmp.lt.s32.totalorder %s6698_s25, %s6698_s25 }
  0x32   :  { %p6705_p9 = por %p6704_p8, %p6703_p7 }
  0x34   :  { %p6706_p10 = pnand %p6705_p9, %p6699_p6 }
  0x36   :  { %6709 = shalt.err (!%p6706_p10)
}
  0x37   :  { %s6807_s5 = smov 384   ;;  %s6808_s26 = smov 24  }
  0x38   :  { %50 = dma.hbm_to_vmem [thread:$0]  %s7051_s2, 36864, %s45_s24, [#allocation6], %s6807_s5, %s6807_s5, %s6808_s26  }
  0x39   :  { %s6809_s29 = smov [#allocation10]   ;;  %s6810_s0 = smov [#allocation13]  }
  0x3a   :  { %s66_s30 = sshll.u32 %s6809_s29, 4  ;;  %s88_s9 = sshll.u32 %s6810_s0, 4  ;;  %s67_s30 = int_to_ptr.vmem [resolvable:$true] %s66_s30  ;;  %s89_s9 = int_to_ptr.vmem [resolvable:$true] %s88_s9 }
  0x3b   :  { %s6718_s10 = scalar_lea.vmem %s67_s30, 36864  ;;  %p6723_p12 = scmp.lt.s32.totalorder %s67_s30, %s67_s30 }
  0x3c   :  { %p6719_p11 = scmp.ne.s32.totalorder %s67_s30, %s6718_s10  ;;  %p6724_p13 = scmp.lt.s32.totalorder %s6718_s10, %s6718_s10 }
  0x3e   :  { %p6725_p0 = por %p6724_p13, %p6723_p12 }
  0x40   :  { %p6726_p1 = pnand %p6725_p0, %p6719_p11 }
  0x42   :  { %6729 = shalt.err (!%p6726_p1)
}
  0x43   :  { %72 = dma.hbm_to_vmem [thread:$0]  %s7053_s4, 36864, %s67_s30, [#allocation9], %s6807_s5, %s6807_s5, %s6808_s26  }
  0x44   :  { %s6738_s13 = scalar_lea.vmem %s89_s9, 6144  ;;  %p6743_p3 = scmp.lt.s32.totalorder %s89_s9, %s89_s9 }
  0x45   :  { %p6739_p2 = scmp.ne.s32.totalorder %s89_s9, %s6738_s13  ;;  %p6744_p4 = scmp.lt.s32.totalorder %s6738_s13, %s6738_s13 }
  0x47   :  { %p6745_p5 = por %p6744_p4, %p6743_p3 }
  0x49   :  { %p6746_p6 = pnand %p6745_p5, %p6739_p2 }
  0x4b   :  { %6749 = shalt.err (!%p6746_p6)
}
  0x4c   :  { %s6811_s2 = smov 64   ;;  %s6812_s14 = smov 4  }
  0x4d   :  { %94 = dma.hbm_to_vmem [thread:$0]  %s7055_s6, 6144, %s89_s9, [#allocation12], %s6811_s2, %s6811_s2, %s6812_s14  }
  0x4e   :  { %s6813_s17 = smov [#allocation14]  }
  0x4f   :  { %s101_s18 = sshll.u32 %s6813_s17, 4  ;;  %s102_s18 = int_to_ptr.vmem [resolvable:$true] %s101_s18 }
  0x50   :  { %s6758_s19 = scalar_lea.vmem %s102_s18, 16  ;;  %s6762_s4 = scalar_lea.vmem %s102_s18, 32 }
  0x51   :  { %p6759_p7 = scmp.ne.s32.totalorder %s102_s18, %s6758_s19  ;;  %p6763_p8 = scmp.lt.s32.totalorder %s102_s18, %s102_s18 }
  0x52   :  { %p6764_p9 = scmp.lt.s32.totalorder %s6762_s4, %s6758_s19 }
  0x54   :  { %p6765_p10 = por %p6764_p9, %p6763_p8 }
  0x56   :  { %p6766_p11 = pnand %p6765_p10, %p6759_p7 }
  0x58   :  { %6769 = shalt.err (!%p6766_p11)
}
  0x59   :  { %104 = dma.hbm_to_vmem [thread:$0]  %s7056_s7, 16, %s102_s18, [#allocation15]  }
  0x5a   :  { %6790 = dma.done.wait [#allocation3], 768  }
  0x5b   :  { %6791 = vsyncadd [#allocation3], 4294966528 }
  0x5c   :  { %6792 = dma.done.wait [#allocation6], 37632  }
  0x5d   :  { %6793 = vsyncadd [#allocation6], 4294929664 }
  0x5e   :  { %6794 = dma.done.wait [#allocation9], 36960  }
  0x5f   :  { %6795 = vsyncadd [#allocation9], 4294930336 }
  0x60   :  { %6796 = dma.done.wait [#allocation12], 6240  }
  0x61   :  { %6797 = vsyncadd [#allocation12], 4294961056 }
  0x62   :  { %6798 = dma.done.wait [#allocation15], 16  }
  0x63   :  { %6799 = vsyncadd [#allocation15], 4294967280  ;;  %v5698_v0 = vld [vmem:[#allocation7 + $0x154] ss:$24 sps:$4 sm:$0xff]   ;;  %v5700_v1 = vld [vmem:[#allocation7 + $0x150] ss:$24 sps:$4 sm:$0xff]  }
  0x64   :  { %1902 = vmatprep.subr.bf16.mxu0 %v5698_v0  ;;  %v5701_v2 = vld [vmem:[#allocation7 + $0x454] ss:$24 sps:$4 sm:$0xff]   ;;  %v5703_v3 = vld [vmem:[#allocation7 + $0x450] ss:$24 sps:$4 sm:$0xff]   ;;  %v5704_v4 = vld [vmem:[#allocation7 + $0x124] ss:$24 sps:$4 sm:$0xff]  }
  0x65   :  { %1903 = vmatpush1.bf16.msra.mxu0 %v5700_v1  ;;  %v5706_v5 = vld [vmem:[#allocation7 + $0x120] ss:$24 sps:$4 sm:$0xff]   ;;  %1943 = vmatprep.subr.bf16.mxu1 %v5701_v2  ;;  %v5707_v6 = vld [vmem:[#allocation7 + $0x424] ss:$24 sps:$4 sm:$0xff]   ;;  %v5710_v8 = vld [vmem:[#allocation7 + $0xf4] ss:$24 sps:$4 sm:$0xff]  }
  0x66   :  { %1944 = vmatpush1.bf16.msra.mxu1 %v5703_v3  ;;  %1904 = vmatprep.subr.bf16.mxu0 %v5704_v4  ;;  %v5709_v7 = vld [vmem:[#allocation7 + $0x420] ss:$24 sps:$4 sm:$0xff]   ;;  %v5712_v9 = vld [vmem:[#allocation7 + $0xf0] ss:$24 sps:$4 sm:$0xff]   ;;  %v5713_v10 = vld [vmem:[#allocation7 + $0x3f4] ss:$24 sps:$4 sm:$0xff]  }
  0x67   :  { %1945 = vmatprep.subr.bf16.mxu1 %v5707_v6  ;;  %v5716_v11 = vld [vmem:[#allocation7 + $0xc4] ss:$24 sps:$4 sm:$0xff]   ;;  %v5715_v12 = vld [vmem:[#allocation7 + $0x3f0] ss:$24 sps:$4 sm:$0xff]   ;;  %v5718_v14 = vld [vmem:[#allocation7 + $0xc0] ss:$24 sps:$4 sm:$0xff]  }
  0x68   :  { %v5719_v13 = vld [vmem:[#allocation7 + $0x3c4] ss:$24 sps:$4 sm:$0xff]   ;;  %v5722_v15 = vld [vmem:[#allocation7 + $0x94] ss:$24 sps:$4 sm:$0xff]   ;;  %v5721_v16 = vld [vmem:[#allocation7 + $0x3c0] ss:$24 sps:$4 sm:$0xff]  }
  0x69   :  { %1905 = vmatpush1.bf16.msra.mxu0 %v5706_v5  ;;  %v5725_v17 = vld [vmem:[#allocation7 + $0x394] ss:$24 sps:$4 sm:$0xff]   ;;  %v5724_v18 = vld [vmem:[#allocation7 + $0x90] ss:$24 sps:$4 sm:$0xff]   ;;  %v5728_v19 = vld [vmem:[#allocation7 + $0x64] ss:$24 sps:$4 sm:$0xff]  }
  0x6a   :  { %1906 = vmatprep.subr.bf16.mxu0 %v5710_v8  ;;  %1946 = vmatpush1.bf16.msra.mxu1 %v5709_v7  ;;  %v5727_v20 = vld [vmem:[#allocation7 + $0x390] ss:$24 sps:$4 sm:$0xff]   ;;  %v5731_v21 = vld [vmem:[#allocation7 + $0x364] ss:$24 sps:$4 sm:$0xff]   ;;  %v5730_v22 = vld [vmem:[#allocation7 + $0x60] ss:$24 sps:$4 sm:$0xff]  }
  0x6b   :  { %1947 = vmatprep.subr.bf16.mxu1 %v5713_v10  ;;  %v5734_v23 = vld [vmem:[#allocation7 + $0x34] ss:$24 sps:$4 sm:$0xff]   ;;  %v5733_v24 = vld [vmem:[#allocation7 + $0x360] ss:$24 sps:$4 sm:$0xff]   ;;  %v5736_v26 = vld [vmem:[#allocation7 + $0x30] ss:$24 sps:$4 sm:$0xff]  }
  0x6c   :  { %v5737_v25 = vld [vmem:[#allocation7 + $0x334] ss:$24 sps:$4 sm:$0xff]   ;;  %v5740_v27 = vld [vmem:[#allocation7 + $0x4] ss:$24 sps:$4 sm:$0xff]   ;;  %v5739_v28 = vld [vmem:[#allocation7 + $0x330] ss:$24 sps:$4 sm:$0xff]  }
  0x6d   :  { %1907 = vmatpush1.bf16.msra.mxu0 %v5712_v9  ;;  %v5743_v29 = vld [vmem:[#allocation7 + $0x304] ss:$24 sps:$4 sm:$0xff]   ;;  %v5742_v30 = vld [vmem:[#allocation7] ss:$24 sps:$4 sm:$0xff]   ;;  %v5746_v31 = vld [vmem:[#allocation7 + $0x2d4] ss:$24 sps:$4 sm:$0xff]  }
  0x6e   :  { %1908 = vmatprep.subr.bf16.mxu0 %v5716_v11  ;;  %1948 = vmatpush1.bf16.msra.mxu1 %v5715_v12  ;;  %v5745_v32 = vld [vmem:[#allocation7 + $0x300] ss:$24 sps:$4 sm:$0xff]   ;;  %v5749_v33 = vld [vmem:[#allocation7 + $0x5d4] ss:$24 sps:$4 sm:$0xff]   ;;  %v5748_v34 = vld [vmem:[#allocation7 + $0x2d0] ss:$24 sps:$4 sm:$0xff]  }
  0x6f   :  { %1949 = vmatprep.subr.bf16.mxu1 %v5719_v13  ;;  %v5752_v35 = vld [vmem:[#allocation7 + $0x2a4] ss:$24 sps:$4 sm:$0xff]   ;;  %v5751_v36 = vld [vmem:[#allocation7 + $0x5d0] ss:$24 sps:$4 sm:$0xff]   ;;  %v5754_v38 = vld [vmem:[#allocation7 + $0x2a0] ss:$24 sps:$4 sm:$0xff]  }
  0x70   :  { %v5755_v37 = vld [vmem:[#allocation7 + $0x5a4] ss:$24 sps:$4 sm:$0xff]   ;;  %v5758_v39 = vld [vmem:[#allocation7 + $0x274] ss:$24 sps:$4 sm:$0xff]   ;;  %v5757_v40 = vld [vmem:[#allocation7 + $0x5a0] ss:$24 sps:$4 sm:$0xff]  }
  0x71   :  { %1909 = vmatpush1.bf16.msra.mxu0 %v5718_v14  ;;  %v5761_v41 = vld [vmem:[#allocation7 + $0x574] ss:$24 sps:$4 sm:$0xff]   ;;  %v5760_v42 = vld [vmem:[#allocation7 + $0x270] ss:$24 sps:$4 sm:$0xff]   ;;  %v5764_v43 = vld [vmem:[#allocation7 + $0x244] ss:$24 sps:$4 sm:$0xff]  }
  0x72   :  { %1910 = vmatprep.subr.bf16.mxu0 %v5722_v15  ;;  %1950 = vmatpush1.bf16.msra.mxu1 %v5721_v16  ;;  %v5763_v44 = vld [vmem:[#allocation7 + $0x570] ss:$24 sps:$4 sm:$0xff]   ;;  %v5767_v45 = vld [vmem:[#allocation7 + $0x544] ss:$24 sps:$4 sm:$0xff]   ;;  %v5766_v47 = vld [vmem:[#allocation7 + $0x240] ss:$24 sps:$4 sm:$0xff]  }
  0x73   :  { %1951 = vmatprep.subr.bf16.mxu1 %v5725_v17  ;;  %v131_v46 = vld [vmem:[#allocation2 + $0x8] sm:$0xff]  ;;  %v133_v50 = vld [vmem:[#allocation2 + $0x18] sm:$0xff]  ;;  %v130_v4 = vld [vmem:[#allocation2] sm:$0xff]  ;;  %s6814_s6 = smov [#allocation16]  }
  0x74   :  { %v6884_v48 = vpack.c.bf16 %v131_v46, %v131_v46  ;;  %v5770_v49 = vld [vmem:[#allocation7 + $0x214] ss:$24 sps:$4 sm:$0xff]   ;;  %v5769_v51 = vld [vmem:[#allocation7 + $0x540] ss:$24 sps:$4 sm:$0xff]   ;;  %v6887_v52 = vpack.c.bf16 %v133_v50, %v133_v50  ;;  %v5772_v54 = vld [vmem:[#allocation7 + $0x210] ss:$24 sps:$4 sm:$0xff]   ;;  %v6890_v7 = vpack.c.bf16 %v130_v4, %v130_v4 }
  0x75   :  { %1911 = vmatpush1.bf16.msra.mxu0 %v5724_v18  ;;  %v5773_v53 = vld [vmem:[#allocation7 + $0x514] ss:$24 sps:$4 sm:$0xff]   ;;  %v5776_v55 = vld [vmem:[#allocation7 + $0x1e4] ss:$24 sps:$4 sm:$0xff]   ;;  %v5775_v56 = vld [vmem:[#allocation7 + $0x510] ss:$24 sps:$4 sm:$0xff]  }
  0x76   :  { %1912 = vmatprep.subr.bf16.mxu0 %v5728_v19  ;;  %1952 = vmatpush1.bf16.msra.mxu1 %v5727_v20  ;;  %v5779_v57 = vld [vmem:[#allocation7 + $0x4e4] ss:$24 sps:$4 sm:$0xff]   ;;  %v5778_v58 = vld [vmem:[#allocation7 + $0x1e0] ss:$24 sps:$4 sm:$0xff]   ;;  %v5782_v59 = vld [vmem:[#allocation7 + $0x1b4] ss:$24 sps:$4 sm:$0xff]  }
  0x77   :  { %1953 = vmatprep.subr.bf16.mxu1 %v5731_v21  ;;  %1934 = vmatprep.mubr.bf16.mxu0 %v6884_v48  ;;  %v5781_v60 = vld [vmem:[#allocation7 + $0x4e0] ss:$24 sps:$4 sm:$0xff]   ;;  %v5785_v61 = vld [vmem:[#allocation7 + $0x4b4] ss:$24 sps:$4 sm:$0xff]   ;;  %v5784_v62 = vld [vmem:[#allocation7 + $0x1b0] ss:$24 sps:$4 sm:$0xff]  }
  0x78   :  { %1975 = vmatprep.mubr.bf16.mxu1 %v6887_v52  ;;  %v5788_v63 = vld [vmem:[#allocation7 + $0x184] ss:$24 sps:$4 sm:$0xff]   ;;  %v5787_v0 = vld [vmem:[#allocation7 + $0x4b0] ss:$24 sps:$4 sm:$0xff]   ;;  %v5790_v1 = vld [vmem:[#allocation7 + $0x180] ss:$24 sps:$4 sm:$0xff]  }
  0x79   :  { %1913 = vmatpush1.bf16.msra.mxu0 %v5730_v22  ;;  %v5791_v2 = vld [vmem:[#allocation7 + $0x484] ss:$24 sps:$4 sm:$0xff]   ;;  %v5793_v3 = vld [vmem:[#allocation7 + $0x480] ss:$24 sps:$4 sm:$0xff]   ;;  %v5796_v5 = vld [vmem:[#allocation7 + $0x754] ss:$24 sps:$4 sm:$0xff]  }
  0x7a   :  { %1914 = vmatprep.subr.bf16.mxu0 %v5734_v23  ;;  %1954 = vmatpush1.bf16.msra.mxu1 %v5733_v24  ;;  %v132_v6 = vld [vmem:[#allocation2 + $0x10] sm:$0xff]  ;;  %v5802_v11 = vld [vmem:[#allocation7 + $0x724] ss:$24 sps:$4 sm:$0xff]   ;;  %v5800_v14 = vld [vmem:[#allocation7 + $0x720] ss:$24 sps:$4 sm:$0xff]   ;;  %s4981_s7 = sshll.u32 %s6814_s6, 4  ;;  %s4982_s7 = int_to_ptr.vmem [resolvable:$true] %s4981_s7 }
  0x7b   :  { %1955 = vmatprep.subr.bf16.mxu1 %v5737_v25  ;;  %v5799_v8 = vld [vmem:[#allocation7 + $0x15c] ss:$24 sps:$4 sm:$0xff]   ;;  %v5794_v9 = vld [vmem:[#allocation7 + $0x750] ss:$24 sps:$4 sm:$0xff]   ;;  %v6892_v10 = vpack.c.bf16 %v132_v6, %v132_v6  ;;  %v5805_v13 = vld [vmem:[#allocation7 + $0x12c] ss:$24 sps:$4 sm:$0xff]   ;;  %p6775_p13 = scmp.lt.s32.totalorder %s4982_s7, %s4982_s7 }
  0x7c   :  { %v5797_v12 = vld [vmem:[#allocation7 + $0x158] ss:$24 sps:$4 sm:$0xff]   ;;  %v5808_v15 = vld [vmem:[#allocation7 + $0x6f4] ss:$24 sps:$4 sm:$0xff]   ;;  %v5803_v16 = vld [vmem:[#allocation7 + $0x128] ss:$24 sps:$4 sm:$0xff]  }
  0x7d   :  { %1915 = vmatpush1.bf16.msra.mxu0 %v5736_v26  ;;  %v5811_v17 = vld [vmem:[#allocation7 + $0xfc] ss:$24 sps:$4 sm:$0xff]   ;;  %v5806_v18 = vld [vmem:[#allocation7 + $0x6f0] ss:$24 sps:$4 sm:$0xff]   ;;  %v5817_v21 = vld [vmem:[#allocation7 + $0xcc] ss:$24 sps:$4 sm:$0xff]  }
  0x7e   :  { %1916 = vmatprep.subr.bf16.mxu0 %v5740_v27  ;;  %1956 = vmatpush1.bf16.msra.mxu1 %v5739_v28  ;;  %v5814_v19 = vld [vmem:[#allocation7 + $0x6c4] ss:$24 sps:$4 sm:$0xff]   ;;  %v5809_v20 = vld [vmem:[#allocation7 + $0xf8] ss:$24 sps:$4 sm:$0xff]   ;;  %v5820_v23 = vld [vmem:[#allocation7 + $0x694] ss:$24 sps:$4 sm:$0xff]  }
  0x7f   :  { %1957 = vmatprep.subr.bf16.mxu1 %v5743_v29  ;;  %v5812_v22 = vld [vmem:[#allocation7 + $0x6c0] ss:$24 sps:$4 sm:$0xff]   ;;  %v5823_v25 = vld [vmem:[#allocation7 + $0x9c] ss:$24 sps:$4 sm:$0xff]   ;;  %v5818_v26 = vld [vmem:[#allocation7 + $0x690] ss:$24 sps:$4 sm:$0xff]  }
  0x80   :  { %v5815_v24 = vld [vmem:[#allocation7 + $0xc8] ss:$24 sps:$4 sm:$0xff]   ;;  %v5826_v27 = vld [vmem:[#allocation7 + $0x664] ss:$24 sps:$4 sm:$0xff]   ;;  %v5821_v28 = vld [vmem:[#allocation7 + $0x98] ss:$24 sps:$4 sm:$0xff]  }
  0x81   :  { %1917 = vmatpush1.bf16.msra.mxu0 %v5742_v30  ;;  %v5829_v29 = vld [vmem:[#allocation7 + $0x6c] ss:$24 sps:$4 sm:$0xff]   ;;  %v5824_v30 = vld [vmem:[#allocation7 + $0x660] ss:$24 sps:$4 sm:$0xff]   ;;  %v5878_v6 = vld [vmem:[#allocation7 + $0x7b0] ss:$24 sps:$4 sm:$0xff]  }
  0x82   :  { %1918 = vmatprep.subr.bf16.mxu0 %v5746_v31  ;;  %1958 = vmatpush1.bf16.msra.mxu1 %v5745_v32  ;;  %v5832_v31 = vld [vmem:[#allocation7 + $0x634] ss:$24 sps:$4 sm:$0xff]   ;;  %v5827_v32 = vld [vmem:[#allocation7 + $0x68] ss:$24 sps:$4 sm:$0xff]   ;;  %v5845_v46 = vld [vmem:[#allocation7 + $0x2d8] ss:$24 sps:$4 sm:$0xff]  }
  0x83   :  { %1959 = vmatprep.subr.bf16.mxu1 %v5749_v33  ;;  %v5835_v33 = vld [vmem:[#allocation7 + $0x3c] ss:$24 sps:$4 sm:$0xff]   ;;  %v5875_v4 = vld [vmem:[#allocation7 + $0x1e8] ss:$24 sps:$4 sm:$0xff]   ;;  %s6770_s21 = scalar_lea.vmem %s4982_s7, 128 }
  0x84   :  { %v5856_v50 = vld [vmem:[#allocation7 + $0x874] ss:$24 sps:$4 sm:$0xff]   ;;  %p6771_p12 = scmp.ne.s32.totalorder %s4982_s7, %s6770_s21  ;;  %p6776_p0 = scmp.lt.s32.totalorder %s6770_s21, %s6770_s21 }
  0x85   :  { %1919 = vmatpush2.bf16.msra.mxu0 %v5748_v34  ;;  %v135_v34 = vld [vmem:[#allocation2 + $0x28] sm:$0xff] }
  0x86   :  { %1920 = vmatprep.subr.bf16.mxu0 %v5752_v35  ;;  %1960 = vmatpush2.bf16.msra.mxu1 %v5751_v36  ;;  %v5830_v35 = vld [vmem:[#allocation7 + $0x630] ss:$24 sps:$4 sm:$0xff]   ;;  %v6897_v36 = vpack.c.bf16 %v135_v34, %v135_v34  ;;  %p6777_p1 = por %p6776_p0, %p6775_p13 }
  0x87   :  { %1961 = vmatprep.subr.bf16.mxu1 %v5755_v37  ;;  %v5838_v37 = vld [vmem:[#allocation7 + $0x604] ss:$24 sps:$4 sm:$0xff]   ;;  %v5914_v34 = vld [vmem:[#allocation7 + $0x398] ss:$24 sps:$4 sm:$0xff]  }
  0x88   :  { %p6778_p2 = pnand %p6777_p1, %p6771_p12 }
  0x89   :  { %1921 = vmatpush2.bf16.msra.mxu0 %v5754_v38  ;;  %v5833_v38 = vld [vmem:[#allocation7 + $0x38] ss:$24 sps:$4 sm:$0xff]  }
  0x8a   :  { %1922 = vmatprep.subr.bf16.mxu0 %v5758_v39  ;;  %1962 = vmatpush2.bf16.msra.mxu1 %v5757_v40  ;;  %v5841_v39 = vld [vmem:[#allocation7 + $0xc] ss:$24 sps:$4 sm:$0xff]   ;;  %v5836_v40 = vld [vmem:[#allocation7 + $0x600] ss:$24 sps:$4 sm:$0xff]  }
  0x8b   :  { %1963 = vmatprep.subr.bf16.mxu1 %v5761_v41  ;;  %v5844_v41 = vld [vmem:[#allocation7 + $0x8d4] ss:$24 sps:$4 sm:$0xff]  }
  0x8d   :  { %1923 = vmatpush2.bf16.msra.mxu0 %v5760_v42  ;;  %v5839_v42 = vld [vmem:[#allocation7 + $0x8] ss:$24 sps:$4 sm:$0xff]  }
  0x8e   :  { %1924 = vmatprep.subr.bf16.mxu0 %v5764_v43  ;;  %1964 = vmatpush2.bf16.msra.mxu1 %v5763_v44  ;;  %v5847_v43 = vld [vmem:[#allocation7 + $0x2dc] ss:$24 sps:$4 sm:$0xff]   ;;  %v5842_v44 = vld [vmem:[#allocation7 + $0x8d0] ss:$24 sps:$4 sm:$0xff]  }
  0x8f   :  { %1965 = vmatprep.subr.bf16.mxu1 %v5767_v45  ;;  %v5850_v45 = vld [vmem:[#allocation7 + $0x8a4] ss:$24 sps:$4 sm:$0xff]  }
  0x91   :  { %1925 = vmatpush2.bf16.msra.mxu0 %v5766_v47  ;;  %v5853_v47 = vld [vmem:[#allocation7 + $0x2ac] ss:$24 sps:$4 sm:$0xff]  }
  0x92   :  { %1926 = vmatprep.subr.bf16.mxu0 %v5770_v49  ;;  %1966 = vmatpush2.bf16.msra.mxu1 %v5769_v51  ;;  %v5848_v49 = vld [vmem:[#allocation7 + $0x8a0] ss:$24 sps:$4 sm:$0xff]  }
  0x93   :  { %1967 = vmatprep.subr.bf16.mxu1 %v5773_v53  ;;  %v5851_v51 = vld [vmem:[#allocation7 + $0x2a8] ss:$24 sps:$4 sm:$0xff]   ;;  %v5859_v53 = vld [vmem:[#allocation7 + $0x27c] ss:$24 sps:$4 sm:$0xff]  }
  0x95   :  { %1927 = vmatpush2.bf16.msra.mxu0 %v5772_v54  ;;  %v5854_v54 = vld [vmem:[#allocation7 + $0x870] ss:$24 sps:$4 sm:$0xff]  }
  0x96   :  { %1928 = vmatprep.subr.bf16.mxu0 %v5776_v55  ;;  %1968 = vmatpush2.bf16.msra.mxu1 %v5775_v56  ;;  %v5862_v55 = vld [vmem:[#allocation7 + $0x844] ss:$24 sps:$4 sm:$0xff]   ;;  %v5857_v56 = vld [vmem:[#allocation7 + $0x278] ss:$24 sps:$4 sm:$0xff]  }
  0x97   :  { %1969 = vmatprep.subr.bf16.mxu1 %v5779_v57  ;;  %v5865_v57 = vld [vmem:[#allocation7 + $0x24c] ss:$24 sps:$4 sm:$0xff]  }
  0x99   :  { %1929 = vmatpush2.bf16.msra.mxu0 %v5778_v58  ;;  %v5860_v58 = vld [vmem:[#allocation7 + $0x840] ss:$24 sps:$4 sm:$0xff]  }
  0x9a   :  { %1930 = vmatprep.subr.bf16.mxu0 %v5782_v59  ;;  %1970 = vmatpush2.bf16.msra.mxu1 %v5781_v60  ;;  %v5868_v59 = vld [vmem:[#allocation7 + $0x814] ss:$24 sps:$4 sm:$0xff]   ;;  %v5863_v60 = vld [vmem:[#allocation7 + $0x248] ss:$24 sps:$4 sm:$0xff]  }
  0x9b   :  { %1971 = vmatprep.subr.bf16.mxu1 %v5785_v61  ;;  %v5871_v61 = vld [vmem:[#allocation7 + $0x21c] ss:$24 sps:$4 sm:$0xff]  }
  0x9d   :  { %1931 = vmatpush2.bf16.msra.mxu0 %v5784_v62  ;;  %v5866_v62 = vld [vmem:[#allocation7 + $0x810] ss:$24 sps:$4 sm:$0xff]  }
  0x9e   :  { %1932 = vmatprep.subr.bf16.mxu0 %v5788_v63  ;;  %1972 = vmatpush2.bf16.msra.mxu1 %v5787_v0  ;;  %v5874_v63 = vld [vmem:[#allocation7 + $0x7e4] ss:$24 sps:$4 sm:$0xff]   ;;  %v5869_v0 = vld [vmem:[#allocation7 + $0x218] ss:$24 sps:$4 sm:$0xff]  }
  0x9f   :  { %1973 = vmatprep.subr.bf16.mxu1 %v5791_v2  ;;  %v5872_v2 = vld [vmem:[#allocation7 + $0x7e0] ss:$24 sps:$4 sm:$0xff]  }
  0xa1   :  { %1933 = vmatpush2.bf16.msra.mxu0 %v5790_v1  ;;  %v5877_v1 = vld [vmem:[#allocation7 + $0x1ec] ss:$24 sps:$4 sm:$0xff]  }
  0xa2   :  { %1984 = vmatprep.subr.bf16.mxu0 %v5796_v5  ;;  %1974 = vmatpush2.bf16.msra.mxu1 %v5793_v3  ;;  %v5880_v3 = vld [vmem:[#allocation7 + $0x7b4] ss:$24 sps:$4 sm:$0xff]  }
  0xa3   :  { %2025 = vmatprep.subr.bf16.mxu1 %v5799_v8  ;;  %v5883_v5 = vld [vmem:[#allocation7 + $0x1bc] ss:$24 sps:$4 sm:$0xff]  }
  0xa4   :  { %1935 = vmatmul.mubr.bf16.vlgmr.msra.gmra.mxu0 %v6890_v7  ;;  %v5886_v8 = vld [vmem:[#allocation7 + $0x784] ss:$24 sps:$4 sm:$0xff]  }
  0xa5   :  { %1985 = vmatpush1.bf16.msra.mxu0 %v5794_v9  ;;  %1976 = vmatmul.mubr.bf16.vlgmr.msra.gmra.mxu1 %v6892_v10  ;;  %v5881_v9 = vld [vmem:[#allocation7 + $0x1b8] ss:$24 sps:$4 sm:$0xff]  }
  0xa6   :  { %1986 = vmatprep.subr.bf16.mxu0 %v5802_v11  ;;  %2026 = vmatpush1.bf16.msra.mxu1 %v5797_v12  ;;  %v5884_v11 = vld [vmem:[#allocation7 + $0x780] ss:$24 sps:$4 sm:$0xff]   ;;  %v5889_v12 = vld [vmem:[#allocation7 + $0x18c] ss:$24 sps:$4 sm:$0xff]  }
  0xa7   :  { %2057 = vmatprep.mubr.bf16.mxu1 %v6884_v48  ;;  %2027 = vmatprep.subr.bf16.mxu1 %v5805_v13  ;;  %v134_v13 = vld [vmem:[#allocation2 + $0x20] sm:$0xff] }
  0xa8   :  { %2016 = vmatprep.mubr.bf16.mxu0 %v6897_v36 }
  0xa9   :  { %1987 = vmatpush1.bf16.msra.mxu0 %v5800_v14  ;;  %v5892_v14 = vld [vmem:[#allocation7 + $0x45c] ss:$24 sps:$4 sm:$0xff]  }
  0xaa   :  { %1988 = vmatprep.subr.bf16.mxu0 %v5808_v15  ;;  %2028 = vmatpush1.bf16.msra.mxu1 %v5803_v16  ;;  %v5887_v15 = vld [vmem:[#allocation7 + $0x188] ss:$24 sps:$4 sm:$0xff]   ;;  %v6900_v16 = vpack.c.bf16 %v134_v13, %v134_v13 }
  0xab   :  { %2029 = vmatprep.subr.bf16.mxu1 %v5811_v17  ;;  %v5895_v17 = vld [vmem:[#allocation7 + $0x75c] ss:$24 sps:$4 sm:$0xff]   ;;  %v5971_v13 = vld [vmem:[#allocation7 + $0x7e8] ss:$24 sps:$4 sm:$0xff]  }
  0xad   :  { %1989 = vmatpush1.bf16.msra.mxu0 %v5806_v18  ;;  %v5890_v18 = vld [vmem:[#allocation7 + $0x458] ss:$24 sps:$4 sm:$0xff]  }
  0xae   :  { %1990 = vmatprep.subr.bf16.mxu0 %v5814_v19  ;;  %2030 = vmatpush1.bf16.msra.mxu1 %v5809_v20  ;;  %v5898_v19 = vld [vmem:[#allocation7 + $0x42c] ss:$24 sps:$4 sm:$0xff]   ;;  %v5893_v20 = vld [vmem:[#allocation7 + $0x758] ss:$24 sps:$4 sm:$0xff]  }
  0xaf   :  { %2031 = vmatprep.subr.bf16.mxu1 %v5817_v21  ;;  %v5901_v21 = vld [vmem:[#allocation7 + $0x72c] ss:$24 sps:$4 sm:$0xff]  }
  0xb1   :  { %1991 = vmatpush1.bf16.msra.mxu0 %v5812_v22  ;;  %v5896_v22 = vld [vmem:[#allocation7 + $0x428] ss:$24 sps:$4 sm:$0xff]  }
  0xb2   :  { %1992 = vmatprep.subr.bf16.mxu0 %v5820_v23  ;;  %2032 = vmatpush1.bf16.msra.mxu1 %v5815_v24  ;;  %v5904_v23 = vld [vmem:[#allocation7 + $0x3fc] ss:$24 sps:$4 sm:$0xff]   ;;  %v5899_v24 = vld [vmem:[#allocation7 + $0x728] ss:$24 sps:$4 sm:$0xff]  }
  0xb3   :  { %2033 = vmatprep.subr.bf16.mxu1 %v5823_v25  ;;  %v5907_v25 = vld [vmem:[#allocation7 + $0x6fc] ss:$24 sps:$4 sm:$0xff]  }
  0xb5   :  { %1993 = vmatpush1.bf16.msra.mxu0 %v5818_v26  ;;  %v5902_v26 = vld [vmem:[#allocation7 + $0x3f8] ss:$24 sps:$4 sm:$0xff]  }
  0xb6   :  { %1994 = vmatprep.subr.bf16.mxu0 %v5826_v27  ;;  %2034 = vmatpush1.bf16.msra.mxu1 %v5821_v28  ;;  %v5910_v27 = vld [vmem:[#allocation7 + $0x3cc] ss:$24 sps:$4 sm:$0xff]   ;;  %v5905_v28 = vld [vmem:[#allocation7 + $0x6f8] ss:$24 sps:$4 sm:$0xff]  }
  0xb7   :  { %2035 = vmatprep.subr.bf16.mxu1 %v5829_v29  ;;  %v5913_v29 = vld [vmem:[#allocation7 + $0x6cc] ss:$24 sps:$4 sm:$0xff]  }
  0xb9   :  { %1995 = vmatpush1.bf16.msra.mxu0 %v5824_v30  ;;  %v5908_v30 = vld [vmem:[#allocation7 + $0x3c8] ss:$24 sps:$4 sm:$0xff]  }
  0xba   :  { %1996 = vmatprep.subr.bf16.mxu0 %v5832_v31  ;;  %2036 = vmatpush1.bf16.msra.mxu1 %v5827_v32  ;;  %v5916_v31 = vld [vmem:[#allocation7 + $0x39c] ss:$24 sps:$4 sm:$0xff]   ;;  %v5911_v32 = vld [vmem:[#allocation7 + $0x6c8] ss:$24 sps:$4 sm:$0xff]  }
  0xbb   :  { %2037 = vmatprep.subr.bf16.mxu1 %v5835_v33  ;;  %v5919_v33 = vld [vmem:[#allocation7 + $0x69c] ss:$24 sps:$4 sm:$0xff]  }
  0xbd   :  { %1997 = vmatpush1.bf16.msra.mxu0 %v5830_v35  ;;  %v5922_v35 = vld [vmem:[#allocation7 + $0x36c] ss:$24 sps:$4 sm:$0xff]  }
  0xbe   :  { %1998 = vmatprep.subr.bf16.mxu0 %v5838_v37  ;;  %2038 = vmatpush1.bf16.msra.mxu1 %v5833_v38  ;;  %v5917_v37 = vld [vmem:[#allocation7 + $0x698] ss:$24 sps:$4 sm:$0xff]   ;;  %v5925_v38 = vld [vmem:[#allocation7 + $0x66c] ss:$24 sps:$4 sm:$0xff]  }
  0xbf   :  { %2039 = vmatprep.subr.bf16.mxu1 %v5841_v39  ;;  %v5920_v39 = vld [vmem:[#allocation7 + $0x368] ss:$24 sps:$4 sm:$0xff]  }
  0xc1   :  { %1999 = vmatpush1.bf16.msra.mxu0 %v5836_v40  ;;  %v5928_v40 = vld [vmem:[#allocation7 + $0x33c] ss:$24 sps:$4 sm:$0xff]  }
  0xc2   :  { %2000 = vmatprep.subr.bf16.mxu0 %v5844_v41  ;;  %2040 = vmatpush1.bf16.msra.mxu1 %v5839_v42  ;;  %v5923_v41 = vld [vmem:[#allocation7 + $0x668] ss:$24 sps:$4 sm:$0xff]   ;;  %v5931_v42 = vld [vmem:[#allocation7 + $0x63c] ss:$24 sps:$4 sm:$0xff]  }
  0xc3   :  { %2041 = vmatprep.subr.bf16.mxu1 %v5847_v43  ;;  %v5926_v43 = vld [vmem:[#allocation7 + $0x338] ss:$24 sps:$4 sm:$0xff]  }
  0xc5   :  { %2001 = vmatpush2.bf16.msra.mxu0 %v5842_v44  ;;  %v5934_v44 = vld [vmem:[#allocation7 + $0x30c] ss:$24 sps:$4 sm:$0xff]  }
  0xc6   :  { %2002 = vmatprep.subr.bf16.mxu0 %v5850_v45  ;;  %2042 = vmatpush2.bf16.msra.mxu1 %v5845_v46  ;;  %v5929_v45 = vld [vmem:[#allocation7 + $0x638] ss:$24 sps:$4 sm:$0xff]   ;;  %v5937_v46 = vld [vmem:[#allocation7 + $0x60c] ss:$24 sps:$4 sm:$0xff]  }
  0xc7   :  { %2043 = vmatprep.subr.bf16.mxu1 %v5853_v47  ;;  %v5932_v47 = vld [vmem:[#allocation7 + $0x308] ss:$24 sps:$4 sm:$0xff]  }
  0xc9   :  { %2003 = vmatpush2.bf16.msra.mxu0 %v5848_v49  ;;  %v5940_v49 = vld [vmem:[#allocation7 + $0x5dc] ss:$24 sps:$4 sm:$0xff]  }
  0xca   :  { %2004 = vmatprep.subr.bf16.mxu0 %v5856_v50  ;;  %2044 = vmatpush2.bf16.msra.mxu1 %v5851_v51  ;;  %v5935_v50 = vld [vmem:[#allocation7 + $0x608] ss:$24 sps:$4 sm:$0xff]   ;;  %v5943_v51 = vld [vmem:[#allocation7 + $0x8dc] ss:$24 sps:$4 sm:$0xff]  }
  0xcb   :  { %2045 = vmatprep.subr.bf16.mxu1 %v5859_v53  ;;  %v5938_v53 = vld [vmem:[#allocation7 + $0x5d8] ss:$24 sps:$4 sm:$0xff]  }
  0xcd   :  { %2005 = vmatpush2.bf16.msra.mxu0 %v5854_v54  ;;  %v5946_v54 = vld [vmem:[#allocation7 + $0x5ac] ss:$24 sps:$4 sm:$0xff]  }
  0xce   :  { %2006 = vmatprep.subr.bf16.mxu0 %v5862_v55  ;;  %2046 = vmatpush2.bf16.msra.mxu1 %v5857_v56  ;;  %v5941_v55 = vld [vmem:[#allocation7 + $0x8d8] ss:$24 sps:$4 sm:$0xff]   ;;  %v5949_v56 = vld [vmem:[#allocation7 + $0x8ac] ss:$24 sps:$4 sm:$0xff]  }
  0xcf   :  { %2047 = vmatprep.subr.bf16.mxu1 %v5865_v57  ;;  %v5944_v57 = vld [vmem:[#allocation7 + $0x5a8] ss:$24 sps:$4 sm:$0xff]  }
  0xd1   :  { %2007 = vmatpush2.bf16.msra.mxu0 %v5860_v58  ;;  %v5952_v58 = vld [vmem:[#allocation7 + $0x57c] ss:$24 sps:$4 sm:$0xff]  }
  0xd2   :  { %2008 = vmatprep.subr.bf16.mxu0 %v5868_v59  ;;  %2048 = vmatpush2.bf16.msra.mxu1 %v5863_v60  ;;  %v5947_v59 = vld [vmem:[#allocation7 + $0x8a8] ss:$24 sps:$4 sm:$0xff]   ;;  %v5955_v60 = vld [vmem:[#allocation7 + $0x87c] ss:$24 sps:$4 sm:$0xff]  }
  0xd3   :  { %2049 = vmatprep.subr.bf16.mxu1 %v5871_v61  ;;  %v5950_v61 = vld [vmem:[#allocation7 + $0x578] ss:$24 sps:$4 sm:$0xff]  }
  0xd5   :  { %2009 = vmatpush2.bf16.msra.mxu0 %v5866_v62  ;;  %v5958_v62 = vld [vmem:[#allocation7 + $0x54c] ss:$24 sps:$4 sm:$0xff]  }
  0xd6   :  { %2010 = vmatprep.subr.bf16.mxu0 %v5874_v63  ;;  %2050 = vmatpush2.bf16.msra.mxu1 %v5869_v0  ;;  %v5953_v63 = vld [vmem:[#allocation7 + $0x878] ss:$24 sps:$4 sm:$0xff]   ;;  %v5961_v0 = vld [vmem:[#allocation7 + $0x84c] ss:$24 sps:$4 sm:$0xff]  }
  0xd7   :  { %2051 = vmatprep.subr.bf16.mxu1 %v5877_v1  ;;  %v5956_v1 = vld [vmem:[#allocation7 + $0x548] ss:$24 sps:$4 sm:$0xff]  }
  0xd9   :  { %2011 = vmatpush2.bf16.msra.mxu0 %v5872_v2  ;;  %v5964_v2 = vld [vmem:[#allocation7 + $0x51c] ss:$24 sps:$4 sm:$0xff]  }
  0xda   :  { %2012 = vmatprep.subr.bf16.mxu0 %v5880_v3  ;;  %2052 = vmatpush2.bf16.msra.mxu1 %v5875_v4  ;;  %v5959_v3 = vld [vmem:[#allocation7 + $0x848] ss:$24 sps:$4 sm:$0xff]   ;;  %v5967_v4 = vld [vmem:[#allocation7 + $0x81c] ss:$24 sps:$4 sm:$0xff]  }
  0xdb   :  { %2053 = vmatprep.subr.bf16.mxu1 %v5883_v5  ;;  %v5962_v5 = vld [vmem:[#allocation7 + $0x518] ss:$24 sps:$4 sm:$0xff]  }
  0xdd   :  { %2013 = vmatpush2.bf16.msra.mxu0 %v5878_v6  ;;  %v5970_v6 = vld [vmem:[#allocation7 + $0x4ec] ss:$24 sps:$4 sm:$0xff]  }
  0xde   :  { %2014 = vmatprep.subr.bf16.mxu0 %v5886_v8  ;;  %2054 = vmatpush2.bf16.msra.mxu1 %v5881_v9  ;;  %v5965_v8 = vld [vmem:[#allocation7 + $0x818] ss:$24 sps:$4 sm:$0xff]   ;;  %v5973_v9 = vld [vmem:[#allocation7 + $0x7ec] ss:$24 sps:$4 sm:$0xff]  }
  0xdf   :  { %2055 = vmatprep.subr.bf16.mxu1 %v5889_v12  ;;  %v5976_v12 = vld [vmem:[#allocation7 + $0x4bc] ss:$24 sps:$4 sm:$0xff]  }
  0xe1   :  { %2015 = vmatpush2.bf16.msra.mxu0 %v5884_v11  ;;  %v5968_v11 = vld [vmem:[#allocation7 + $0x4e8] ss:$24 sps:$4 sm:$0xff]  }
  0xe2   :  { %2066 = vmatprep.subr.bf16.mxu0 %v5892_v14  ;;  %2056 = vmatpush2.bf16.msra.mxu1 %v5887_v15  ;;  %v5979_v14 = vld [vmem:[#allocation7 + $0x7bc] ss:$24 sps:$4 sm:$0xff]   ;;  %v5974_v15 = vld [vmem:[#allocation7 + $0x4b8] ss:$24 sps:$4 sm:$0xff]  }
  0xe3   :  { %2107 = vmatprep.subr.bf16.mxu1 %v5895_v17  ;;  %v5982_v17 = vld [vmem:[#allocation7 + $0x48c] ss:$24 sps:$4 sm:$0xff]  }
  0xe4   :  { %2017 = vmatmul.mubr.bf16.vlgmr.msra.gmra.mxu0 %v6900_v16 }
  0xe5   :  { %2067 = vmatpush1.bf16.msra.mxu0 %v5890_v18  ;;  %2098 = vmatprep.mubr.bf16.mxu0 %v6887_v52  ;;  %v5977_v18 = vld [vmem:[#allocation7 + $0x7b8] ss:$24 sps:$4 sm:$0xff]  }
  0xe6   :  { %2058 = vmatmul.mubr.bf16.vlgmr.msra.gmra.mxu1 %v6890_v7  ;;  %2068 = vmatprep.subr.bf16.mxu0 %v5898_v19  ;;  %v5985_v19 = vld [vmem:[#allocation7 + $0x78c] ss:$24 sps:$4 sm:$0xff]  }
  0xe7   :  { %2108 = vmatpush1.bf16.msra.mxu1 %v5893_v20  ;;  %2139 = vmatprep.mubr.bf16.mxu1 %v6897_v36  ;;  %v5980_v20 = vld [vmem:[#allocation7 + $0x488] ss:$24 sps:$4 sm:$0xff]  }
  0xe8   :  { %2109 = vmatprep.subr.bf16.mxu1 %v5901_v21  ;;  %v5988_v21 = vld [vmem:[#allocation7 + $0x164] ss:$24 sps:$4 sm:$0xff]  }
  0xe9   :  { %2069 = vmatpush1.bf16.msra.mxu0 %v5896_v22  ;;  %v5983_v22 = vld [vmem:[#allocation7 + $0x788] ss:$24 sps:$4 sm:$0xff]  }
  0xea   :  { %2070 = vmatprep.subr.bf16.mxu0 %v5904_v23  ;;  %v5991_v23 = vld [vmem:[#allocation7 + $0x464] ss:$24 sps:$4 sm:$0xff]  }
  0xeb   :  { %2110 = vmatpush1.bf16.msra.mxu1 %v5899_v24  ;;  %v5986_v24 = vld [vmem:[#allocation7 + $0x160] ss:$24 sps:$4 sm:$0xff]  }
  0xec   :  { %2111 = vmatprep.subr.bf16.mxu1 %v5907_v25  ;;  %v5994_v25 = vld [vmem:[#allocation7 + $0x134] ss:$24 sps:$4 sm:$0xff]  }
  0xed   :  { %2071 = vmatpush1.bf16.msra.mxu0 %v5902_v26  ;;  %v5989_v26 = vld [vmem:[#allocation7 + $0x460] ss:$24 sps:$4 sm:$0xff]  }
  0xee   :  { %2072 = vmatprep.subr.bf16.mxu0 %v5910_v27  ;;  %v5997_v27 = vld [vmem:[#allocation7 + $0x434] ss:$24 sps:$4 sm:$0xff]  }
  0xef   :  { %2112 = vmatpush1.bf16.msra.mxu1 %v5905_v28  ;;  %v5992_v28 = vld [vmem:[#allocation7 + $0x130] ss:$24 sps:$4 sm:$0xff]  }
  0xf0   :  { %2113 = vmatprep.subr.bf16.mxu1 %v5913_v29  ;;  %v6000_v29 = vld [vmem:[#allocation7 + $0x104] ss:$24 sps:$4 sm:$0xff]  }
  0xf1   :  { %2073 = vmatpush1.bf16.msra.mxu0 %v5908_v30  ;;  %v5995_v30 = vld [vmem:[#allocation7 + $0x430] ss:$24 sps:$4 sm:$0xff]  }
  0xf2   :  { %2074 = vmatprep.subr.bf16.mxu0 %v5916_v31  ;;  %v6003_v31 = vld [vmem:[#allocation7 + $0x404] ss:$24 sps:$4 sm:$0xff]  }
  0xf3   :  { %2114 = vmatpush1.bf16.msra.mxu1 %v5911_v32  ;;  %v5998_v32 = vld [vmem:[#allocation7 + $0x100] ss:$24 sps:$4 sm:$0xff]  }
  0xf4   :  { %2115 = vmatprep.subr.bf16.mxu1 %v5919_v33  ;;  %v6006_v33 = vld [vmem:[#allocation7 + $0xd4] ss:$24 sps:$4 sm:$0xff]  }
  0xf5   :  { %2075 = vmatpush1.bf16.msra.mxu0 %v5914_v34  ;;  %v6001_v34 = vld [vmem:[#allocation7 + $0x400] ss:$24 sps:$4 sm:$0xff]  }
  0xf6   :  { %2076 = vmatprep.subr.bf16.mxu0 %v5922_v35  ;;  %v6009_v35 = vld [vmem:[#allocation7 + $0x3d4] ss:$24 sps:$4 sm:$0xff]  }
  0xf7   :  { %2116 = vmatpush1.bf16.msra.mxu1 %v5917_v37  ;;  %v6012_v37 = vld [vmem:[#allocation7 + $0xa4] ss:$24 sps:$4 sm:$0xff]  }
  0xf8   :  { %2117 = vmatprep.subr.bf16.mxu1 %v5925_v38  ;;  %v6007_v38 = vld [vmem:[#allocation7 + $0x3d0] ss:$24 sps:$4 sm:$0xff]  }
  0xf9   :  { %2077 = vmatpush1.bf16.msra.mxu0 %v5920_v39  ;;  %v6015_v39 = vld [vmem:[#allocation7 + $0x3a4] ss:$24 sps:$4 sm:$0xff]  }
  0xfa   :  { %2078 = vmatprep.subr.bf16.mxu0 %v5928_v40  ;;  %v6018_v40 = vld [vmem:[#allocation7 + $0x74] ss:$24 sps:$4 sm:$0xff]  }
  0xfb   :  { %2118 = vmatpush1.bf16.msra.mxu1 %v5923_v41  ;;  %v6013_v41 = vld [vmem:[#allocation7 + $0x3a0] ss:$24 sps:$4 sm:$0xff]  }
  0xfc   :  { %2119 = vmatprep.subr.bf16.mxu1 %v5931_v42  ;;  %v6021_v42 = vld [vmem:[#allocation7 + $0x374] ss:$24 sps:$4 sm:$0xff]  }
  0xfd   :  { %2079 = vmatpush1.bf16.msra.mxu0 %v5926_v43  ;;  %v6016_v43 = vld [vmem:[#allocation7 + $0x70] ss:$24 sps:$4 sm:$0xff]  }
  0xfe   :  { %2080 = vmatprep.subr.bf16.mxu0 %v5934_v44  ;;  %v6024_v44 = vld [vmem:[#allocation7 + $0x44] ss:$24 sps:$4 sm:$0xff]  }
  0xff   :  { %2120 = vmatpush1.bf16.msra.mxu1 %v5929_v45  ;;  %v6019_v45 = vld [vmem:[#allocation7 + $0x370] ss:$24 sps:$4 sm:$0xff]  }
 0x100   :  { %2121 = vmatprep.subr.bf16.mxu1 %v5937_v46  ;;  %v6027_v46 = vld [vmem:[#allocation7 + $0x344] ss:$24 sps:$4 sm:$0xff]  }
 0x101   :  { %2081 = vmatpush1.bf16.msra.mxu0 %v5932_v47  ;;  %v6022_v47 = vld [vmem:[#allocation7 + $0x40] ss:$24 sps:$4 sm:$0xff]  }
 0x102   :  { %2082 = vmatprep.subr.bf16.mxu0 %v5940_v49  ;;  %v6030_v49 = vld [vmem:[#allocation7 + $0x14] ss:$24 sps:$4 sm:$0xff]  }
 0x103   :  { %2122 = vmatpush1.bf16.msra.mxu1 %v5935_v50  ;;  %v6025_v50 = vld [vmem:[#allocation7 + $0x340] ss:$24 sps:$4 sm:$0xff]  }
 0x104   :  { %2123 = vmatprep.subr.bf16.mxu1 %v5943_v51  ;;  %v6033_v51 = vld [vmem:[#allocation7 + $0x314] ss:$24 sps:$4 sm:$0xff]  }
 0x105   :  { %2083 = vmatpush2.bf16.msra.mxu0 %v5938_v53  ;;  %v6028_v53 = vld [vmem:[#allocation7 + $0x10] ss:$24 sps:$4 sm:$0xff]  }
 0x106   :  { %2084 = vmatprep.subr.bf16.mxu0 %v5946_v54  ;;  %v6036_v54 = vld [vmem:[#allocation7 + $0x2e4] ss:$24 sps:$4 sm:$0xff]  }
 0x107   :  { %2124 = vmatpush2.bf16.msra.mxu1 %v5941_v55  ;;  %v6031_v55 = vld [vmem:[#allocation7 + $0x310] ss:$24 sps:$4 sm:$0xff]  }
 0x108   :  { %2125 = vmatprep.subr.bf16.mxu1 %v5949_v56  ;;  %v6039_v56 = vld [vmem:[#allocation7 + $0x5e4] ss:$24 sps:$4 sm:$0xff]  }
 0x109   :  { %2085 = vmatpush2.bf16.msra.mxu0 %v5944_v57  ;;  %v6034_v57 = vld [vmem:[#allocation7 + $0x2e0] ss:$24 sps:$4 sm:$0xff]  }
 0x10a   :  { %2086 = vmatprep.subr.bf16.mxu0 %v5952_v58  ;;  %v6042_v58 = vld [vmem:[#allocation7 + $0x2b4] ss:$24 sps:$4 sm:$0xff]  }
 0x10b   :  { %2126 = vmatpush2.bf16.msra.mxu1 %v5947_v59  ;;  %v6037_v59 = vld [vmem:[#allocation7 + $0x5e0] ss:$24 sps:$4 sm:$0xff]  }
 0x10c   :  { %2127 = vmatprep.subr.bf16.mxu1 %v5955_v60  ;;  %v6040_v60 = vld [vmem:[#allocation7 + $0x2b0] ss:$24 sps:$4 sm:$0xff]  }
 0x10d   :  { %2087 = vmatpush2.bf16.msra.mxu0 %v5950_v61  ;;  %v6045_v61 = vld [vmem:[#allocation7 + $0x5b4] ss:$24 sps:$4 sm:$0xff]  }
 0x10e   :  { %2088 = vmatprep.subr.bf16.mxu0 %v5958_v62  ;;  %v6043_v62 = vld [vmem:[#allocation7 + $0x5b0] ss:$24 sps:$4 sm:$0xff]  }
 0x10f   :  { %2128 = vmatpush2.bf16.msra.mxu1 %v5953_v63  ;;  %v6048_v63 = vld [vmem:[#allocation7 + $0x284] ss:$24 sps:$4 sm:$0xff]  }
 0x110   :  { %2129 = vmatprep.subr.bf16.mxu1 %v5961_v0  ;;  %v6046_v0 = vld [vmem:[#allocation7 + $0x280] ss:$24 sps:$4 sm:$0xff]  }
 0x111   :  { %2089 = vmatpush2.bf16.msra.mxu0 %v5956_v1  ;;  %v6051_v1 = vld [vmem:[#allocation7 + $0x584] ss:$24 sps:$4 sm:$0xff]  }
 0x112   :  { %2090 = vmatprep.subr.bf16.mxu0 %v5964_v2  ;;  %v6049_v2 = vld [vmem:[#allocation7 + $0x580] ss:$24 sps:$4 sm:$0xff]  }
 0x113   :  { %2130 = vmatpush2.bf16.msra.mxu1 %v5959_v3  ;;  %v6054_v3 = vld [vmem:[#allocation7 + $0x254] ss:$24 sps:$4 sm:$0xff]  }
 0x114   :  { %2131 = vmatprep.subr.bf16.mxu1 %v5967_v4  ;;  %v6057_v4 = vld [vmem:[#allocation7 + $0x554] ss:$24 sps:$4 sm:$0xff]  }
 0x115   :  { %2091 = vmatpush2.bf16.msra.mxu0 %v5962_v5  ;;  %v6052_v5 = vld [vmem:[#allocation7 + $0x250] ss:$24 sps:$4 sm:$0xff]  }
 0x116   :  { %2092 = vmatprep.subr.bf16.mxu0 %v5970_v6  ;;  %v6055_v6 = vld [vmem:[#allocation7 + $0x550] ss:$24 sps:$4 sm:$0xff]  }
 0x117   :  { %2132 = vmatpush2.bf16.msra.mxu1 %v5965_v8  ;;  %v6060_v8 = vld [vmem:[#allocation7 + $0x224] ss:$24 sps:$4 sm:$0xff]  }
 0x118   :  { %2133 = vmatprep.subr.bf16.mxu1 %v5973_v9  ;;  %v6063_v9 = vld [vmem:[#allocation7 + $0x524] ss:$24 sps:$4 sm:$0xff]  }
 0x119   :  { %2093 = vmatpush2.bf16.msra.mxu0 %v5968_v11  ;;  %v6058_v11 = vld [vmem:[#allocation7 + $0x220] ss:$24 sps:$4 sm:$0xff]  }
 0x11a   :  { %2094 = vmatprep.subr.bf16.mxu0 %v5976_v12  ;;  %v6061_v12 = vld [vmem:[#allocation7 + $0x520] ss:$24 sps:$4 sm:$0xff]  }
 0x11b   :  { %2134 = vmatpush2.bf16.msra.mxu1 %v5971_v13  ;;  %v6066_v13 = vld [vmem:[#allocation7 + $0x1f4] ss:$24 sps:$4 sm:$0xff]  }
 0x11c   :  { %2135 = vmatprep.subr.bf16.mxu1 %v5979_v14  ;;  %v6069_v14 = vld [vmem:[#allocation7 + $0x4f4] ss:$24 sps:$4 sm:$0xff]  }
 0x11d   :  { %2095 = vmatpush2.bf16.msra.mxu0 %v5974_v15  ;;  %v6064_v15 = vld [vmem:[#allocation7 + $0x1f0] ss:$24 sps:$4 sm:$0xff]  }
 0x11e   :  { %2096 = vmatprep.subr.bf16.mxu0 %v5982_v17  ;;  %v6072_v17 = vld [vmem:[#allocation7 + $0x1c4] ss:$24 sps:$4 sm:$0xff]  }
 0x11f   :  { %2136 = vmatpush2.bf16.msra.mxu1 %v5977_v18  ;;  %v6067_v18 = vld [vmem:[#allocation7 + $0x4f0] ss:$24 sps:$4 sm:$0xff]  }
 0x120   :  { %2137 = vmatprep.subr.bf16.mxu1 %v5985_v19  ;;  %v6075_v19 = vld [vmem:[#allocation7 + $0x4c4] ss:$24 sps:$4 sm:$0xff]  }
 0x121   :  { %2097 = vmatpush2.bf16.msra.mxu0 %v5980_v20  ;;  %v6070_v20 = vld [vmem:[#allocation7 + $0x1c0] ss:$24 sps:$4 sm:$0xff]  }
 0x122   :  { %2148 = vmatprep.subr.bf16.mxu0 %v5988_v21  ;;  %v6078_v21 = vld [vmem:[#allocation7 + $0x194] ss:$24 sps:$4 sm:$0xff]  }
 0x123   :  { %2138 = vmatpush2.bf16.msra.mxu1 %v5983_v22  ;;  %v6073_v22 = vld [vmem:[#allocation7 + $0x4c0] ss:$24 sps:$4 sm:$0xff]  }
 0x124   :  { %2099 = vmatmul.mubr.bf16.vlgmr.msra.gmra.mxu0 %v6892_v10  ;;  %2189 = vmatprep.subr.bf16.mxu1 %v5991_v23  ;;  %v6081_v23 = vld [vmem:[#allocation7 + $0x494] ss:$24 sps:$4 sm:$0xff]  }
 0x125   :  { %2149 = vmatpush1.bf16.msra.mxu0 %v5986_v24  ;;  %2180 = vmatprep.mubr.bf16.mxu0 %v6884_v48  ;;  %v6004_v48 = vld [vmem:[#allocation7 + $0xd0] ss:$24 sps:$4 sm:$0xff]  }
 0x126   :  { %2140 = vmatmul.mubr.bf16.vlgmr.msra.gmra.mxu1 %v6900_v16  ;;  %2150 = vmatprep.subr.bf16.mxu0 %v5994_v25  ;;  %v6076_v24 = vld [vmem:[#allocation7 + $0x190] ss:$24 sps:$4 sm:$0xff]   ;;  %v6084_v25 = vld [vmem:[#allocation7 + $0x764] ss:$24 sps:$4 sm:$0xff]  }
 0x127   :  { %2190 = vmatpush1.bf16.msra.mxu1 %v5989_v26  ;;  %2221 = vmatprep.mubr.bf16.mxu1 %v6887_v52  ;;  %v6010_v52 = vld [vmem:[#allocation7 + $0xa0] ss:$24 sps:$4 sm:$0xff]   ;;  %v6079_v26 = vld [vmem:[#allocation7 + $0x490] ss:$24 sps:$4 sm:$0xff]  }
 0x128   :  { %2191 = vmatprep.subr.bf16.mxu1 %v5997_v27  ;;  %v6096_v27 = vld [vmem:[#allocation10 + $0x154] ss:$24 sps:$4 sm:$0xff]  }
 0x129   :  { %2151 = vmatpush1.bf16.msra.mxu0 %v5992_v28  ;;  %v6082_v28 = vld [vmem:[#allocation7 + $0x760] ss:$24 sps:$4 sm:$0xff]  }
 0x12a   :  { %2152 = vmatprep.subr.bf16.mxu0 %v6000_v29  ;;  %v6087_v29 = vld [vmem:[#allocation7 + $0x734] ss:$24 sps:$4 sm:$0xff]  }
 0x12b   :  { %2192 = vmatpush1.bf16.msra.mxu1 %v5995_v30  ;;  %v6094_v30 = vld [vmem:[#allocation10 + $0x150] ss:$24 sps:$4 sm:$0xff]  }
 0x12c   :  { %2193 = vmatprep.subr.bf16.mxu1 %v6003_v31  ;;  %v6085_v31 = vld [vmem:[#allocation7 + $0x730] ss:$24 sps:$4 sm:$0xff]  }
 0x12d   :  { %2153 = vmatpush1.bf16.msra.mxu0 %v5998_v32 }
 0x12e   :  { %2154 = vmatprep.subr.bf16.mxu0 %v6006_v33  ;;  %v6090_v33 = vld [vmem:[#allocation7 + $0x704] ss:$24 sps:$4 sm:$0xff]  }
 0x12f   :  { %2194 = vmatpush1.bf16.msra.mxu1 %v6001_v34  ;;  %v6102_v34 = vld [vmem:[#allocation10 + $0x124] ss:$24 sps:$4 sm:$0xff]  }
 0x130   :  { %2195 = vmatprep.subr.bf16.mxu1 %v6009_v35  ;;  %v6100_v35 = vld [vmem:[#allocation10 + $0x120] ss:$24 sps:$4 sm:$0xff]  }
 0x131   :  { %2155 = vmatpush1.bf16.msra.mxu0 %v6004_v48 }
 0x132   :  { %2156 = vmatprep.subr.bf16.mxu0 %v6012_v37 }
 0x133   :  { %2196 = vmatpush1.bf16.msra.mxu1 %v6007_v38  ;;  %v6088_v38 = vld [vmem:[#allocation7 + $0x700] ss:$24 sps:$4 sm:$0xff]  }
 0x134   :  { %2197 = vmatprep.subr.bf16.mxu1 %v6015_v39 }
 0x135   :  { %2157 = vmatpush1.bf16.msra.mxu0 %v6010_v52 }
 0x136   :  { %2158 = vmatprep.subr.bf16.mxu0 %v6018_v40  ;;  %v6093_v40 = vld [vmem:[#allocation7 + $0x6d4] ss:$24 sps:$4 sm:$0xff]  }
 0x137   :  { %2198 = vmatpush1.bf16.msra.mxu1 %v6013_v41 }
 0x138   :  { %2199 = vmatprep.subr.bf16.mxu1 %v6021_v42 }
 0x139   :  { %2159 = vmatpush1.bf16.msra.mxu0 %v6016_v43  ;;  %v6106_v43 = vld [vmem:[#allocation10 + $0xf0] ss:$24 sps:$4 sm:$0xff]  }
 0x13a   :  { %2160 = vmatprep.subr.bf16.mxu0 %v6024_v44  ;;  %v6114_v44 = vld [vmem:[#allocation10 + $0xc4] ss:$24 sps:$4 sm:$0xff]  }
 0x13b   :  { %2200 = vmatpush1.bf16.msra.mxu1 %v6019_v45 }
 0x13c   :  { %2201 = vmatprep.subr.bf16.mxu1 %v6027_v46  ;;  %v6112_v46 = vld [vmem:[#allocation10 + $0xc0] ss:$24 sps:$4 sm:$0xff]  }
 0x13d   :  { %2161 = vmatpush1.bf16.msra.mxu0 %v6022_v47  ;;  %v6097_v47 = vld [vmem:[#allocation7 + $0x6a0] ss:$24 sps:$4 sm:$0xff]  }
 0x13e   :  { %2162 = vmatprep.subr.bf16.mxu0 %v6030_v49  ;;  %v6105_v49 = vld [vmem:[#allocation7 + $0x674] ss:$24 sps:$4 sm:$0xff]  }
 0x13f   :  { %2202 = vmatpush1.bf16.msra.mxu1 %v6025_v50  ;;  %v6120_v50 = vld [vmem:[#allocation10 + $0x94] ss:$24 sps:$4 sm:$0xff]  }
 0x140   :  { %2203 = vmatprep.subr.bf16.mxu1 %v6033_v51  ;;  %v6118_v51 = vld [vmem:[#allocation10 + $0x90] ss:$24 sps:$4 sm:$0xff]  }
 0x141   :  { %2163 = vmatpush1.bf16.msra.mxu0 %v6028_v53  ;;  %v6103_v53 = vld [vmem:[#allocation7 + $0x670] ss:$24 sps:$4 sm:$0xff]  }
 0x142   :  { %2164 = vmatprep.subr.bf16.mxu0 %v6036_v54  ;;  %v6111_v54 = vld [vmem:[#allocation7 + $0x644] ss:$24 sps:$4 sm:$0xff]  }
 0x143   :  { %2204 = vmatpush1.bf16.msra.mxu1 %v6031_v55  ;;  %v6126_v55 = vld [vmem:[#allocation10 + $0x64] ss:$24 sps:$4 sm:$0xff]  }
 0x144   :  { %2205 = vmatprep.subr.bf16.mxu1 %v6039_v56  ;;  %v6124_v56 = vld [vmem:[#allocation10 + $0x60] ss:$24 sps:$4 sm:$0xff]  }
 0x145   :  { %2165 = vmatpush2.bf16.msra.mxu0 %v6034_v57  ;;  %v6109_v57 = vld [vmem:[#allocation7 + $0x640] ss:$24 sps:$4 sm:$0xff]  }
 0x146   :  { %2166 = vmatprep.subr.bf16.mxu0 %v6042_v58  ;;  %v6117_v58 = vld [vmem:[#allocation7 + $0x614] ss:$24 sps:$4 sm:$0xff]  }
 0x147   :  { %2206 = vmatpush2.bf16.msra.mxu1 %v6037_v59  ;;  %v6132_v59 = vld [vmem:[#allocation10 + $0x34] ss:$24 sps:$4 sm:$0xff]  }
 0x148   :  { %2207 = vmatprep.subr.bf16.mxu1 %v6045_v61  ;;  %v6115_v61 = vld [vmem:[#allocation7 + $0x610] ss:$24 sps:$4 sm:$0xff]  }
 0x149   :  { %2167 = vmatpush2.bf16.msra.mxu0 %v6040_v60  ;;  %v6130_v60 = vld [vmem:[#allocation10 + $0x30] ss:$24 sps:$4 sm:$0xff]  }
 0x14a   :  { %2168 = vmatprep.subr.bf16.mxu0 %v6048_v63  ;;  %v6138_v63 = vld [vmem:[#allocation10 + $0x4] ss:$24 sps:$4 sm:$0xff]  }
 0x14b   :  { %2208 = vmatpush2.bf16.msra.mxu1 %v6043_v62  ;;  %v6123_v62 = vld [vmem:[#allocation7 + $0x8e4] ss:$24 sps:$4 sm:$0xff]  }
 0x14c   :  { %2209 = vmatprep.subr.bf16.mxu1 %v6051_v1  ;;  %v6121_v1 = vld [vmem:[#allocation7 + $0x8e0] ss:$24 sps:$4 sm:$0xff]  }
 0x14d   :  { %2169 = vmatpush2.bf16.msra.mxu0 %v6046_v0  ;;  %v6136_v0 = vld [vmem:[#allocation10] ss:$24 sps:$4 sm:$0xff]  }
 0x14e   :  { %2170 = vmatprep.subr.bf16.mxu0 %v6054_v3  ;;  %v6144_v3 = vld [vmem:[#allocation10 + $0x2d4] ss:$24 sps:$4 sm:$0xff]  }
 0x14f   :  { %2210 = vmatpush2.bf16.msra.mxu1 %v6049_v2  ;;  %v6129_v2 = vld [vmem:[#allocation7 + $0x8b4] ss:$24 sps:$4 sm:$0xff]  }
 0x150   :  { %2211 = vmatprep.subr.bf16.mxu1 %v6057_v4  ;;  %v6142_v4 = vld [vmem:[#allocation10 + $0x2d0] ss:$24 sps:$4 sm:$0xff]  }
 0x151   :  { %2171 = vmatpush2.bf16.msra.mxu0 %v6052_v5  ;;  %v6127_v5 = vld [vmem:[#allocation7 + $0x8b0] ss:$24 sps:$4 sm:$0xff]  }
 0x152   :  { %2172 = vmatprep.subr.bf16.mxu0 %v6060_v8  ;;  %v6150_v8 = vld [vmem:[#allocation10 + $0x2a4] ss:$24 sps:$4 sm:$0xff]  }
 0x153   :  { %2212 = vmatpush2.bf16.msra.mxu1 %v6055_v6  ;;  %v6135_v6 = vld [vmem:[#allocation7 + $0x884] ss:$24 sps:$4 sm:$0xff]  }
 0x154   :  { %2213 = vmatprep.subr.bf16.mxu1 %v6063_v9  ;;  %v6148_v9 = vld [vmem:[#allocation10 + $0x2a0] ss:$24 sps:$4 sm:$0xff]  }
 0x155   :  { %2173 = vmatpush2.bf16.msra.mxu0 %v6058_v11  ;;  %v6133_v11 = vld [vmem:[#allocation7 + $0x880] ss:$24 sps:$4 sm:$0xff]  }
 0x156   :  { %2174 = vmatprep.subr.bf16.mxu0 %v6066_v13  ;;  %v6156_v13 = vld [vmem:[#allocation10 + $0x274] ss:$24 sps:$4 sm:$0xff]  }
 0x157   :  { %2214 = vmatpush2.bf16.msra.mxu1 %v6061_v12  ;;  %v6141_v12 = vld [vmem:[#allocation7 + $0x854] ss:$24 sps:$4 sm:$0xff]  }
 0x158   :  { %2215 = vmatprep.subr.bf16.mxu1 %v6069_v14  ;;  %v6154_v14 = vld [vmem:[#allocation10 + $0x270] ss:$24 sps:$4 sm:$0xff]  }
 0x159   :  { %2175 = vmatpush2.bf16.msra.mxu0 %v6064_v15  ;;  %v6139_v15 = vld [vmem:[#allocation7 + $0x850] ss:$24 sps:$4 sm:$0xff]  }
 0x15a   :  { %2176 = vmatprep.subr.bf16.mxu0 %v6072_v17  ;;  %v6147_v17 = vld [vmem:[#allocation7 + $0x824] ss:$24 sps:$4 sm:$0xff]  }
 0x15b   :  { %2216 = vmatpush2.bf16.msra.mxu1 %v6067_v18  ;;  %v6162_v18 = vld [vmem:[#allocation10 + $0x244] ss:$24 sps:$4 sm:$0xff]  }
 0x15c   :  { %2217 = vmatprep.subr.bf16.mxu1 %v6075_v19  ;;  %v6160_v19 = vld [vmem:[#allocation10 + $0x240] ss:$24 sps:$4 sm:$0xff]  }
 0x15d   :  { %2177 = vmatpush2.bf16.msra.mxu0 %v6070_v20  ;;  %v432_v20 = vlaneseq }
 0x15e   :  { %2178 = vmatprep.subr.bf16.mxu0 %v6078_v21  ;;  %v6145_v21 = vld [vmem:[#allocation7 + $0x820] ss:$24 sps:$4 sm:$0xff]  }
 0x15f   :  { %2218 = vmatpush2.bf16.msra.mxu1 %v6073_v22  ;;  %v6153_v22 = vld [vmem:[#allocation7 + $0x7f4] ss:$24 sps:$4 sm:$0xff]  }
 0x160   :  { %2219 = vmatprep.subr.bf16.mxu1 %v6081_v23  ;;  %v6168_v23 = vld [vmem:[#allocation10 + $0x214] ss:$24 sps:$4 sm:$0xff]  }
 0x161   :  { %2179 = vmatpush2.bf16.msra.mxu0 %v6076_v24  ;;  %v6166_v24 = vld [vmem:[#allocation10 + $0x210] ss:$24 sps:$4 sm:$0xff]  }
 0x162   :  { %2230 = vmatprep.subr.bf16.mxu0 %v6084_v25  ;;  %v6921_v25 = vshrl.u32 %v432_v20, 7  ;;  %v6196_v20 = vld [vmem:[#allocation10 + $0x330] ss:$24 sps:$4 sm:$0xff]  }
 0x163   :  { %2220 = vmatpush2.bf16.msra.mxu1 %v6079_v26  ;;  %v6151_v26 = vld [vmem:[#allocation7 + $0x7f0] ss:$24 sps:$4 sm:$0xff]  }
 0x164   :  { %v6910_v32 = vpop.f32.mrf.mxu0  ;;  %2181 = vmatmul.mubr.bf16.vlgmr.msra.gmra.mxu0 %v6890_v7  ;;  %4067 = vmatprep.subr.bf16.mxu1 %v6096_v27  ;;  %v6108_v7 = vld [vmem:[#allocation10 + $0xf4] ss:$24 sps:$4 sm:$0xff]  }
 0x165   :  { %2231 = vmatpush1.bf16.msra.mxu0 %v6082_v28  ;;  %2262 = vmatprep.mubr.bf16.mxu0 %v6897_v36  ;;  %v6916_v37 = vpop.f32.mrf.mxu1  ;;  %v6091_v36 = vld [vmem:[#allocation7 + $0x6d0] ss:$24 sps:$4 sm:$0xff]   ;;  %v6159_v27 = vld [vmem:[#allocation7 + $0x7c4] ss:$24 sps:$4 sm:$0xff]  }
 0x166   :  { %v6914_v48 = vpop.f32.mrf.mxu0  ;;  %2222 = vmatmul.mubr.bf16.vlgmr.msra.gmra.mxu1 %v6892_v10  ;;  %2232 = vmatprep.subr.bf16.mxu0 %v6087_v29  ;;  %v6099_v10 = vld [vmem:[#allocation7 + $0x6a4] ss:$24 sps:$4 sm:$0xff]  }
 0x167   :  { %4068 = vmatpush1.bf16.msra.mxu1 %v6094_v30  ;;  %v6919_v52 = vpop.f32.mrf.mxu1  ;;  %v6171_v28 = vld [vmem:[#allocation10 + $0x1e4] ss:$24 sps:$4 sm:$0xff]   ;;  %v6169_v29 = vld [vmem:[#allocation10 + $0x1e0] ss:$24 sps:$4 sm:$0xff]  }
 0x168   :  { %v1940_v39 = vpop.f32.mrf.mxu0  ;;  %4069 = vmatprep.subr.bf16.mxu1 %v6102_v34  ;;  %v6923_v30 = vld [vmem:[#allocation8] sm:$0x3f]  ;;  %v6165_v34 = vld [vmem:[#allocation7 + $0x794] ss:$24 sps:$4 sm:$0xff]  }
 0x169   :  { %2233 = vmatpush1.bf16.msra.mxu0 %v6085_v31  ;;  %v1981_v42 = vpop.f32.mrf.mxu1  ;;  %v434_v31 = vsub.s32 0, %v6921_v25  ;;  %v6172_v39 = vld [vmem:[#allocation10 + $0x1b0] ss:$24 sps:$4 sm:$0xff]  }
 0x16a   :  { %v1941_v41 = vpop.f32.mrf.mxu0  ;;  %2234 = vmatprep.subr.bf16.mxu0 %v6090_v33  ;;  %v6157_v33 = vld [vmem:[#allocation7 + $0x7c0] ss:$24 sps:$4 sm:$0xff]  }
 0x16b   :  { %4070 = vmatpush1.bf16.msra.mxu1 %v6100_v35  ;;  %v1982_v45 = vpop.f32.mrf.mxu1  ;;  %v6174_v35 = vld [vmem:[#allocation10 + $0x1b4] ss:$24 sps:$4 sm:$0xff]   ;;  %v6177_v41 = vld [vmem:[#allocation10 + $0x184] ss:$24 sps:$4 sm:$0xff]  }
 0x16c   :  { %4071 = vmatprep.subr.bf16.mxu1 %v6108_v7  ;;  %v435_v7 = vrot.slane %v6923_v30, %v434_v31  ;;  %v6180_v42 = vld [vmem:[#allocation10 + $0x454] ss:$24 sps:$4 sm:$0xff]   ;;  %v6178_v45 = vld [vmem:[#allocation10 + $0x450] ss:$24 sps:$4 sm:$0xff]  }
 0x16d   :  { %2235 = vmatpush1.bf16.msra.mxu0 %v6088_v38  ;;  %v438_v38 = vsub.s32 1, %v6921_v25 }
 0x16e   :  { %2236 = vmatprep.subr.bf16.mxu0 %v6093_v40  ;;  %v6163_v40 = vld [vmem:[#allocation7 + $0x790] ss:$24 sps:$4 sm:$0xff]  }
 0x16f   :  { %4072 = vmatpush1.bf16.msra.mxu1 %v6106_v43  ;;  %v6175_v43 = vld [vmem:[#allocation10 + $0x180] ss:$24 sps:$4 sm:$0xff]  }
 0x170   :  { %4073 = vmatprep.subr.bf16.mxu1 %v6114_v44  ;;  %v1937_v44 = vadd.f32 %v6910_v32, %v435_v7  ;;  %v2289_v32 = vld [vmem:[#allocation5] sm:$0xff] }
 0x171   :  { %2237 = vmatpush1.bf16.msra.mxu0 %v6091_v36  ;;  %v439_v36 = vrot.slane %v6923_v30, %v438_v38  ;;  %v6210_v7 = vld [vmem:[#allocation10 + $0x574] ss:$24 sps:$4 sm:$0xff]  }
 0x172   :  { %2238 = vmatprep.subr.bf16.mxu0 %v6099_v10  ;;  %v6183_v10 = vld [vmem:[#allocation10 + $0x424] ss:$24 sps:$4 sm:$0xff]  }
 0x173   :  { %4074 = vmatpush1.bf16.msra.mxu1 %v6112_v46  ;;  %v1939_v46 = vadd.f32 %v6914_v48, %v439_v36  ;;  %v6213_v36 = vld [vmem:[#allocation10 + $0x544] ss:$24 sps:$4 sm:$0xff]  }
 0x174   :  { %4075 = vmatprep.subr.bf16.mxu1 %v6120_v50 }
 0x175   :  { %2239 = vmatpush1.bf16.msra.mxu0 %v6097_v47  ;;  %v1978_v47 = vadd.f32 %v6916_v37, %v1937_v44  ;;  %v1980_v50 = vadd.f32 %v6919_v52, %v1939_v46  ;;  %v6184_v52 = vld [vmem:[#allocation10 + $0x3f0] ss:$24 sps:$4 sm:$0xff]   ;;  %v6318_v44 = vld [vmem:[#allocation10 + $0x604] ss:$24 sps:$4 sm:$0xff]   ;;  %v6316_v46 = vld [vmem:[#allocation10 + $0x600] ss:$24 sps:$4 sm:$0xff]  }
 0x176   :  { %2240 = vmatprep.subr.bf16.mxu0 %v6105_v49 }
 0x177   :  { %4076 = vmatpush1.bf16.msra.mxu1 %v6118_v51 }
 0x178   :  { %4077 = vmatprep.subr.bf16.mxu1 %v6126_v55  ;;  %v6186_v55 = vld [vmem:[#allocation10 + $0x3f4] ss:$24 sps:$4 sm:$0xff]  }
 0x179   :  { %2241 = vmatpush1.bf16.msra.mxu0 %v6103_v53  ;;  %v6181_v53 = vld [vmem:[#allocation10 + $0x420] ss:$24 sps:$4 sm:$0xff]  }
 0x17a   :  { %2242 = vmatprep.subr.bf16.mxu0 %v6111_v54 }
 0x17b   :  { %4078 = vmatpush1.bf16.msra.mxu1 %v6124_v56 }
 0x17c   :  { %4079 = vmatprep.subr.bf16.mxu1 %v6132_v59 }
 0x17d   :  { %2243 = vmatpush1.bf16.msra.mxu0 %v6109_v57 }
 0x17e   :  { %2244 = vmatprep.subr.bf16.mxu0 %v6117_v58  ;;  %v2290_v58 = vld [vmem:[#allocation5 + $0x8] sm:$0xff] }
 0x17f   :  { %4080 = vmatpush1.bf16.msra.mxu1 %v6130_v60 }
 0x180   :  { %4081 = vmatprep.subr.bf16.mxu1 %v6138_v63 }
 0x181   :  { %2245 = vmatpush1.bf16.msra.mxu0 %v6115_v61 }
 0x182   :  { %2246 = vmatprep.subr.bf16.mxu0 %v6123_v62  ;;  %v6189_v62 = vld [vmem:[#allocation10 + $0x3c4] ss:$24 sps:$4 sm:$0xff]  }
 0x183   :  { %4082 = vmatpush1.bf16.msra.mxu1 %v6136_v0 }
 0x184   :  { %4083 = vmatprep.subr.bf16.mxu1 %v6144_v3  ;;  %v6187_v3 = vld [vmem:[#allocation10 + $0x3c0] ss:$24 sps:$4 sm:$0xff]  }
 0x185   :  { %2247 = vmatpush2.bf16.msra.mxu0 %v6121_v1 }
 0x186   :  { %2248 = vmatprep.subr.bf16.mxu0 %v6129_v2 }
 0x187   :  { %4084 = vmatpush2.bf16.msra.mxu1 %v6142_v4  ;;  %v6192_v4 = vld [vmem:[#allocation10 + $0x394] ss:$24 sps:$4 sm:$0xff]  }
 0x188   :  { %4085 = vmatprep.subr.bf16.mxu1 %v6150_v8 }
 0x189   :  { %2249 = vmatpush2.bf16.msra.mxu0 %v6127_v5 }
 0x18a   :  { %2250 = vmatprep.subr.bf16.mxu0 %v6135_v6 }
 0x18b   :  { %4086 = vmatpush2.bf16.msra.mxu1 %v6148_v9  ;;  %v6276_v9 = vld [vmem:[#allocation10 + $0x754] ss:$24 sps:$4 sm:$0xff]  }
 0x18c   :  { %4087 = vmatprep.subr.bf16.mxu1 %v6156_v13  ;;  %v6195_v13 = vld [vmem:[#allocation10 + $0x364] ss:$24 sps:$4 sm:$0xff]  }
 0x18d   :  { %2251 = vmatpush2.bf16.msra.mxu0 %v6133_v11  ;;  %v6274_v11 = vld [vmem:[#allocation10 + $0x750] ss:$24 sps:$4 sm:$0xff]  }
 0x18e   :  { %2252 = vmatprep.subr.bf16.mxu0 %v6141_v12  ;;  %v6190_v12 = vld [vmem:[#allocation10 + $0x390] ss:$24 sps:$4 sm:$0xff]  }
 0x18f   :  { %4088 = vmatpush2.bf16.msra.mxu1 %v6154_v14  ;;  %v6282_v14 = vld [vmem:[#allocation10 + $0x724] ss:$24 sps:$4 sm:$0xff]  }
 0x190   :  { %4089 = vmatprep.subr.bf16.mxu1 %v6162_v18  ;;  %v6280_v18 = vld [vmem:[#allocation10 + $0x720] ss:$24 sps:$4 sm:$0xff]  }
 0x191   :  { %2253 = vmatpush2.bf16.msra.mxu0 %v6139_v15  ;;  %v6193_v15 = vld [vmem:[#allocation10 + $0x360] ss:$24 sps:$4 sm:$0xff]  }
 0x192   :  { %2254 = vmatprep.subr.bf16.mxu0 %v6147_v17  ;;  %v6198_v17 = vld [vmem:[#allocation10 + $0x334] ss:$24 sps:$4 sm:$0xff]  }
 0x193   :  { %4090 = vmatpush2.bf16.msra.mxu1 %v6160_v19  ;;  %v6288_v19 = vld [vmem:[#allocation10 + $0x6f4] ss:$24 sps:$4 sm:$0xff]  }
 0x194   :  { %4091 = vmatprep.subr.bf16.mxu1 %v6168_v23  ;;  %v6294_v23 = vld [vmem:[#allocation10 + $0x6c4] ss:$24 sps:$4 sm:$0xff]  }
 0x195   :  { %2255 = vmatpush2.bf16.msra.mxu0 %v6145_v21  ;;  %v6201_v21 = vld [vmem:[#allocation10 + $0x304] ss:$24 sps:$4 sm:$0xff]  }
 0x196   :  { %2256 = vmatprep.subr.bf16.mxu0 %v6153_v22  ;;  %v6286_v22 = vld [vmem:[#allocation10 + $0x6f0] ss:$24 sps:$4 sm:$0xff]  }
 0x197   :  { %4092 = vmatpush2.bf16.msra.mxu1 %v6166_v24  ;;  %v6199_v24 = vld [vmem:[#allocation10 + $0x300] ss:$24 sps:$4 sm:$0xff]  }
 0x198   :  { %4093 = vmatprep.subr.bf16.mxu1 %v6171_v28  ;;  %v6300_v28 = vld [vmem:[#allocation10 + $0x694] ss:$24 sps:$4 sm:$0xff]  }
 0x199   :  { %2257 = vmatpush2.bf16.msra.mxu0 %v6151_v26  ;;  %v6204_v26 = vld [vmem:[#allocation10 + $0x5d4] ss:$24 sps:$4 sm:$0xff]  }
 0x19a   :  { %2258 = vmatprep.subr.bf16.mxu0 %v6159_v27  ;;  %v6292_v27 = vld [vmem:[#allocation10 + $0x6c0] ss:$24 sps:$4 sm:$0xff]  }
 0x19b   :  { %4094 = vmatpush2.bf16.msra.mxu1 %v6169_v29  ;;  %v6202_v29 = vld [vmem:[#allocation10 + $0x5d0] ss:$24 sps:$4 sm:$0xff]  }
 0x19c   :  { %4095 = vmatprep.subr.bf16.mxu1 %v6174_v35  ;;  %v6306_v35 = vld [vmem:[#allocation10 + $0x664] ss:$24 sps:$4 sm:$0xff]  }
 0x19d   :  { %2259 = vmatpush2.bf16.msra.mxu0 %v6157_v33  ;;  %v6207_v33 = vld [vmem:[#allocation10 + $0x5a4] ss:$24 sps:$4 sm:$0xff]  }
 0x19e   :  { %2260 = vmatprep.subr.bf16.mxu0 %v6165_v34  ;;  %v6298_v34 = vld [vmem:[#allocation10 + $0x690] ss:$24 sps:$4 sm:$0xff]  }
 0x19f   :  { %4096 = vmatpush2.bf16.msra.mxu1 %v6172_v39  ;;  %v6205_v39 = vld [vmem:[#allocation10 + $0x5a0] ss:$24 sps:$4 sm:$0xff]  }
 0x1a0   :  { %4097 = vmatprep.subr.bf16.mxu1 %v6177_v41  ;;  %v6312_v41 = vld [vmem:[#allocation10 + $0x634] ss:$24 sps:$4 sm:$0xff]  }
 0x1a1   :  { %2261 = vmatpush2.bf16.msra.mxu0 %v6163_v40  ;;  %v6304_v40 = vld [vmem:[#allocation10 + $0x660] ss:$24 sps:$4 sm:$0xff]  }
 0x1a2   :  { %4108 = vmatprep.subr.bf16.mxu0 %v6180_v42  ;;  %v6208_v42 = vld [vmem:[#allocation10 + $0x570] ss:$24 sps:$4 sm:$0xff]  }
 0x1a3   :  { %4098 = vmatpush2.bf16.msra.mxu1 %v6175_v43  ;;  %v6310_v43 = vld [vmem:[#allocation10 + $0x630] ss:$24 sps:$4 sm:$0xff]  }
 0x1a4   :  { %v2018_v49 = vpop.f32.mrf.mxu0  ;;  %2263 = vmatmul.mubr.bf16.vlgmr.msra.gmra.mxu0 %v6900_v16  ;;  %4149 = vmatprep.subr.bf16.mxu1 %v6276_v9  ;;  %v6354_v9 = vld [vmem:[#allocation10 + $0x7e4] ss:$24 sps:$4 sm:$0xff]  }
 0x1a5   :  { %v2019_v51 = vadd.f32 %v2018_v49, %v1978_v47  ;;  %4109 = vmatpush1.bf16.msra.mxu0 %v6178_v45  ;;  %v6211_v45 = vld [vmem:[#allocation10 + $0x540] ss:$24 sps:$4 sm:$0xff]   ;;  %v6324_v47 = vld [vmem:[#allocation10 + $0x8d4] ss:$24 sps:$4 sm:$0xff]   ;;  %v6214_v49 = vld [vmem:[#allocation10 + $0x510] ss:$24 sps:$4 sm:$0xff]  }
 0x1a6   :  { %v2020_v54 = vpop.f32.mrf.mxu0  ;;  %4110 = vmatprep.subr.bf16.mxu0 %v6183_v10  ;;  %v6938_v56 = vpop.f32.mrf.mxu1  ;;  %v6216_v10 = vld [vmem:[#allocation10 + $0x514] ss:$24 sps:$4 sm:$0xff]  }
 0x1a7   :  { %vm2271_vm0 = vcmp.ge.f32.partialorder %v2019_v51, 0.0  ;;  %v2277_v48 = vmul.f32 0.01, %v2019_v51  ;;  %v2021_v57 = vadd.f32 %v2020_v54, %v1980_v50  ;;  %v6322_v50 = vld [vmem:[#allocation10 + $0x8d0] ss:$24 sps:$4 sm:$0xff]  }
 0x1a8   :  { %v2022_v37 = vpop.f32.mrf.mxu0  ;;  %v6940_v59 = vpop.f32.mrf.mxu1  ;;  %v6217_v54 = vld [vmem:[#allocation10 + $0x4e0] ss:$24 sps:$4 sm:$0xff]  }
 0x1a9   :  { %v2283_v60 = vsel %vm2271_vm0, %v2019_v51, %v2277_v48  ;;  %vm2272_vm1 = vcmp.ge.f32.partialorder %v2021_v57, 0.0  ;;  %v2278_v16 = vmul.f32 0.01, %v2021_v57  ;;  %4111 = vmatpush1.bf16.msra.mxu0 %v6181_v53  ;;  %v6219_v51 = vld [vmem:[#allocation10 + $0x4e4] ss:$24 sps:$4 sm:$0xff]  }
 0x1aa   :  { %v2023_v61 = vpop.f32.mrf.mxu0  ;;  %4112 = vmatprep.subr.bf16.mxu0 %v6186_v55  ;;  %v2063_v63 = vpop.f32.mrf.mxu1  ;;  %v2295_v0 = vmul.f32 %v2289_v32, %v2283_v60  ;;  %v6330_v53 = vld [vmem:[#allocation10 + $0x8a4] ss:$24 sps:$4 sm:$0xff]   ;;  %v6328_v32 = vld [vmem:[#allocation10 + $0x8a0] ss:$24 sps:$4 sm:$0xff]   ;;  %v6222_v55 = vld [vmem:[#allocation10 + $0x4b4] ss:$24 sps:$4 sm:$0xff]  }
 0x1ab   :  { %v2284_v1 = vsel %vm2272_vm1, %v2021_v57, %v2278_v16  ;;  %v6336_v48 = vld [vmem:[#allocation10 + $0x874] ss:$24 sps:$4 sm:$0xff]   ;;  %v6334_v57 = vld [vmem:[#allocation10 + $0x870] ss:$24 sps:$4 sm:$0xff]   ;;  %v6225_v60 = vld [vmem:[#allocation10 + $0x484] ss:$24 sps:$4 sm:$0xff]  }
 0x1ac   :  { %v2296_v2 = vmul.f32 %v2290_v58, %v2284_v1  ;;  %v2064_v5 = vpop.f32.mrf.mxu1  ;;  %v6944_v8 = vpack.c.bf16 %v2295_v0, %v2295_v0  ;;  %v442_v58 = vsub.s32 2, %v6921_v25  ;;  %v6220_v37 = vld [vmem:[#allocation10 + $0x4b0] ss:$24 sps:$4 sm:$0xff]   ;;  %v446_v16 = vsub.s32 3, %v6921_v25  ;;  %v6340_v61 = vld [vmem:[#allocation10 + $0x840] ss:$24 sps:$4 sm:$0xff]  }
 0x1ad   :  { %4113 = vmatpush1.bf16.msra.mxu0 %v6184_v52  ;;  %v6342_v52 = vld [vmem:[#allocation10 + $0x844] ss:$24 sps:$4 sm:$0xff]   ;;  %v6223_v63 = vld [vmem:[#allocation10 + $0x480] ss:$24 sps:$4 sm:$0xff]  }
 0x1ae   :  { %v6942_v6 = vpack.c.bf16 %v2296_v2, %v2296_v2  ;;  %4114 = vmatprep.subr.bf16.mxu0 %v6189_v62  ;;  %v443_v62 = vrot.slane %v6923_v30, %v442_v58  ;;  %v6228_v0 = vld [vmem:[#allocation10 + $0x15c] ss:$24 sps:$4 sm:$0xff]   ;;  %v447_v1 = vrot.slane %v6923_v30, %v446_v16 }
 0x1af   :  { %v6348_v2 = vld [vmem:[#allocation10 + $0x814] ss:$24 sps:$4 sm:$0xff]  }
 0x1b0   :  { %4099 = vmatprep.mubr.bf16.mxu1 %v6942_v6  ;;  %v2062_v5 = vadd.f32 %v6940_v59, %v447_v1  ;;  %v2291_v59 = vld [vmem:[#allocation5 + $0x10] sm:$0xff] }
 0x1b1   :  { %4100 = vmatmul.mubr.bf16.vlgmr.msra.gmra.mxu1 %v6944_v8  ;;  %4115 = vmatpush1.bf16.msra.mxu0 %v6187_v3  ;;  %v6346_v3 = vld [vmem:[#allocation10 + $0x810] ss:$24 sps:$4 sm:$0xff]  }
 0x1b2   :  { %4116 = vmatprep.subr.bf16.mxu0 %v6192_v4  ;;  %4150 = vmatpush1.bf16.msra.mxu1 %v6274_v11  ;;  %v2060_v4 = vadd.f32 %v6938_v56, %v443_v62  ;;  %v6358_v56 = vld [vmem:[#allocation10 + $0x7b0] ss:$24 sps:$4 sm:$0xff]   ;;  %v6258_v62 = vld [vmem:[#allocation10 + $0x27c] ss:$24 sps:$4 sm:$0xff]  }
 0x1b3   :  { %4151 = vmatprep.subr.bf16.mxu1 %v6282_v14  ;;  %v6259_v1 = vld [vmem:[#allocation10 + $0x248] ss:$24 sps:$4 sm:$0xff]  }
 0x1b5   :  { %4117 = vmatpush1.bf16.msra.mxu0 %v6190_v12  ;;  %v6352_v12 = vld [vmem:[#allocation10 + $0x7e0] ss:$24 sps:$4 sm:$0xff]  }
 0x1b6   :  { %4118 = vmatprep.subr.bf16.mxu0 %v6195_v13  ;;  %4152 = vmatpush1.bf16.msra.mxu1 %v6280_v18 }
 0x1b7   :  { %4153 = vmatprep.subr.bf16.mxu1 %v6288_v19  ;;  %v6360_v19 = vld [vmem:[#allocation10 + $0x7b4] ss:$24 sps:$4 sm:$0xff]  }
 0x1b9   :  { %4119 = vmatpush1.bf16.msra.mxu0 %v6193_v15 }
 0x1ba   :  { %4120 = vmatprep.subr.bf16.mxu0 %v6198_v17  ;;  %4154 = vmatpush1.bf16.msra.mxu1 %v6286_v22 }
 0x1bb   :  { %4155 = vmatprep.subr.bf16.mxu1 %v6294_v23 }
 0x1bd   :  { %4121 = vmatpush1.bf16.msra.mxu0 %v6196_v20 }
 0x1be   :  { %4122 = vmatprep.subr.bf16.mxu0 %v6201_v21  ;;  %4156 = vmatpush1.bf16.msra.mxu1 %v6292_v27 }
 0x1bf   :  { %4157 = vmatprep.subr.bf16.mxu1 %v6300_v28 }
 0x1c1   :  { %4123 = vmatpush1.bf16.msra.mxu0 %v6199_v24 }
 0x1c2   :  { %4124 = vmatprep.subr.bf16.mxu0 %v6204_v26  ;;  %4158 = vmatpush1.bf16.msra.mxu1 %v6298_v34 }
 0x1c3   :  { %4159 = vmatprep.subr.bf16.mxu1 %v6306_v35  ;;  %v6364_v35 = vld [vmem:[#allocation10 + $0x780] ss:$24 sps:$4 sm:$0xff]  }
 0x1c5   :  { %4125 = vmatpush2.bf16.msra.mxu0 %v6202_v29  ;;  %v2292_v29 = vld [vmem:[#allocation5 + $0x18] sm:$0xff] }
 0x1c6   :  { %4126 = vmatprep.subr.bf16.mxu0 %v6207_v33  ;;  %4160 = vmatpush1.bf16.msra.mxu1 %v6304_v40  ;;  %v6366_v33 = vld [vmem:[#allocation10 + $0x784] ss:$24 sps:$4 sm:$0xff]  }
 0x1c7   :  { %4161 = vmatprep.subr.bf16.mxu1 %v6312_v41  ;;  %v6372_v41 = vld [vmem:[#allocation10 + $0x45c] ss:$24 sps:$4 sm:$0xff]  }
 0x1c9   :  { %4127 = vmatpush2.bf16.msra.mxu0 %v6205_v39 }
 0x1ca   :  { %4128 = vmatprep.subr.bf16.mxu0 %v6210_v7  ;;  %4162 = vmatpush1.bf16.msra.mxu1 %v6310_v43 }
 0x1cb   :  { %4163 = vmatprep.subr.bf16.mxu1 %v6318_v44  ;;  %v6231_v44 = vld [vmem:[#allocation10 + $0x12c] ss:$24 sps:$4 sm:$0xff]  }
 0x1cd   :  { %4129 = vmatpush2.bf16.msra.mxu0 %v6208_v42 }
 0x1ce   :  { %4130 = vmatprep.subr.bf16.mxu0 %v6213_v36  ;;  %4164 = vmatpush1.bf16.msra.mxu1 %v6316_v46  ;;  %v6226_v36 = vld [vmem:[#allocation10 + $0x158] ss:$24 sps:$4 sm:$0xff]  }
 0x1cf   :  { %4165 = vmatprep.subr.bf16.mxu1 %v6324_v47  ;;  %v6232_v46 = vld [vmem:[#allocation10 + $0xf8] ss:$24 sps:$4 sm:$0xff]   ;;  %v6237_v47 = vld [vmem:[#allocation10 + $0xcc] ss:$24 sps:$4 sm:$0xff]  }
 0x1d1   :  { %4131 = vmatpush2.bf16.msra.mxu0 %v6211_v45  ;;  %v6229_v45 = vld [vmem:[#allocation10 + $0x128] ss:$24 sps:$4 sm:$0xff]  }
 0x1d2   :  { %4132 = vmatprep.subr.bf16.mxu0 %v6216_v10  ;;  %4166 = vmatpush2.bf16.msra.mxu1 %v6322_v50  ;;  %v6234_v10 = vld [vmem:[#allocation10 + $0xfc] ss:$24 sps:$4 sm:$0xff]  }
 0x1d3   :  { %4167 = vmatprep.subr.bf16.mxu1 %v6330_v53  ;;  %v6240_v50 = vld [vmem:[#allocation10 + $0x9c] ss:$24 sps:$4 sm:$0xff]   ;;  %v6243_v53 = vld [vmem:[#allocation10 + $0x6c] ss:$24 sps:$4 sm:$0xff]  }
 0x1d5   :  { %4133 = vmatpush2.bf16.msra.mxu0 %v6214_v49  ;;  %v6235_v49 = vld [vmem:[#allocation10 + $0xc8] ss:$24 sps:$4 sm:$0xff]  }
 0x1d6   :  { %4134 = vmatprep.subr.bf16.mxu0 %v6219_v51  ;;  %4168 = vmatpush2.bf16.msra.mxu1 %v6328_v32  ;;  %v6238_v51 = vld [vmem:[#allocation10 + $0x98] ss:$24 sps:$4 sm:$0xff]   ;;  %v6241_v32 = vld [vmem:[#allocation10 + $0x68] ss:$24 sps:$4 sm:$0xff]  }
 0x1d7   :  { %4169 = vmatprep.subr.bf16.mxu1 %v6336_v48  ;;  %v6249_v48 = vld [vmem:[#allocation10 + $0xc] ss:$24 sps:$4 sm:$0xff]  }
 0x1d9   :  { %4135 = vmatpush2.bf16.msra.mxu0 %v6217_v54  ;;  %v6246_v54 = vld [vmem:[#allocation10 + $0x3c] ss:$24 sps:$4 sm:$0xff]  }
 0x1da   :  { %4136 = vmatprep.subr.bf16.mxu0 %v6222_v55  ;;  %4170 = vmatpush2.bf16.msra.mxu1 %v6334_v57  ;;  %v6244_v55 = vld [vmem:[#allocation10 + $0x38] ss:$24 sps:$4 sm:$0xff]   ;;  %v6247_v57 = vld [vmem:[#allocation10 + $0x8] ss:$24 sps:$4 sm:$0xff]  }
 0x1db   :  { %4171 = vmatprep.subr.bf16.mxu1 %v6342_v52  ;;  %v6255_v52 = vld [vmem:[#allocation10 + $0x2ac] ss:$24 sps:$4 sm:$0xff]  }
 0x1dd   :  { %4137 = vmatpush2.bf16.msra.mxu0 %v6220_v37  ;;  %v6252_v37 = vld [vmem:[#allocation10 + $0x2dc] ss:$24 sps:$4 sm:$0xff]  }
 0x1de   :  { %4138 = vmatprep.subr.bf16.mxu0 %v6225_v60  ;;  %4172 = vmatpush2.bf16.msra.mxu1 %v6340_v61  ;;  %v6250_v60 = vld [vmem:[#allocation10 + $0x2d8] ss:$24 sps:$4 sm:$0xff]   ;;  %v6253_v61 = vld [vmem:[#allocation10 + $0x2a8] ss:$24 sps:$4 sm:$0xff]  }
 0x1df   :  { %4173 = vmatprep.subr.bf16.mxu1 %v6348_v2  ;;  %v6264_v2 = vld [vmem:[#allocation10 + $0x21c] ss:$24 sps:$4 sm:$0xff]  }
 0x1e1   :  { %4139 = vmatpush2.bf16.msra.mxu0 %v6223_v63  ;;  %v6256_v63 = vld [vmem:[#allocation10 + $0x278] ss:$24 sps:$4 sm:$0xff]  }
 0x1e2   :  { %4190 = vmatprep.subr.bf16.mxu0 %v6228_v0  ;;  %4174 = vmatpush2.bf16.msra.mxu1 %v6346_v3  ;;  %v6261_v0 = vld [vmem:[#allocation10 + $0x24c] ss:$24 sps:$4 sm:$0xff]   ;;  %v6262_v3 = vld [vmem:[#allocation10 + $0x218] ss:$24 sps:$4 sm:$0xff]  }
 0x1e3   :  { %4175 = vmatprep.subr.bf16.mxu1 %v6354_v9  ;;  %v6265_v9 = vld [vmem:[#allocation10 + $0x1e8] ss:$24 sps:$4 sm:$0xff]  }
 0x1e4   :  { %v2100_v11 = vpop.f32.mrf.mxu0 }
 0x1e5   :  { %v2101_v13 = vadd.f32 %v2100_v11, %v2060_v4  ;;  %v6267_v4 = vld [vmem:[#allocation10 + $0x1ec] ss:$24 sps:$4 sm:$0xff]   ;;  %v6270_v11 = vld [vmem:[#allocation10 + $0x1bc] ss:$24 sps:$4 sm:$0xff]  }
 0x1e6   :  { %v2102_v14 = vpop.f32.mrf.mxu0  ;;  %v2141_v15 = vpop.f32.mrf.mxu1  ;;  %4176 = vmatpush2.bf16.msra.mxu1 %v6352_v12 }
 0x1e7   :  { %v2103_v17 = vadd.f32 %v2102_v14, %v2062_v5  ;;  %v2142_v18 = vadd.f32 %v2141_v15, %v2101_v13  ;;  %4177 = vmatprep.subr.bf16.mxu1 %v6360_v19 }
 0x1e8   :  { %v2104_v20 = vpop.f32.mrf.mxu0  ;;  %v2143_v21 = vpop.f32.mrf.mxu1 }
 0x1e9   :  { %vm2273_vm2 = vcmp.ge.f32.partialorder %v2142_v18, 0.0  ;;  %v2279_v22 = vmul.f32 0.01, %v2142_v18  ;;  %v2144_v23 = vadd.f32 %v2143_v21, %v2103_v17  ;;  %v6268_v17 = vld [vmem:[#allocation10 + $0x1b8] ss:$24 sps:$4 sm:$0xff]  }
 0x1ea   :  { %v2105_v24 = vpop.f32.mrf.mxu0  ;;  %v2145_v26 = vpop.f32.mrf.mxu1  ;;  %4178 = vmatpush2.bf16.msra.mxu1 %v6358_v56  ;;  %v6271_v21 = vld [vmem:[#allocation10 + $0x188] ss:$24 sps:$4 sm:$0xff]  }
 0x1eb   :  { %v2285_v27 = vsel %vm2273_vm2, %v2142_v18, %v2279_v22  ;;  %vm2274_vm3 = vcmp.ge.f32.partialorder %v2144_v23, 0.0  ;;  %v2280_v28 = vmul.f32 0.01, %v2144_v23  ;;  %4179 = vmatprep.subr.bf16.mxu1 %v6366_v33  ;;  %v6273_v18 = vld [vmem:[#allocation10 + $0x18c] ss:$24 sps:$4 sm:$0xff]  }
 0x1ec   :  { %v2146_v34 = vpop.f32.mrf.mxu1  ;;  %v2297_v39 = vmul.f32 %v2291_v59, %v2285_v27  ;;  %v6279_v22 = vld [vmem:[#allocation10 + $0x75c] ss:$24 sps:$4 sm:$0xff]   ;;  %v6285_v59 = vld [vmem:[#allocation10 + $0x72c] ss:$24 sps:$4 sm:$0xff]   ;;  %v6283_v24 = vld [vmem:[#allocation10 + $0x728] ss:$24 sps:$4 sm:$0xff]  }
 0x1ed   :  { %v2286_v7 = vsel %vm2274_vm3, %v2144_v23, %v2280_v28  ;;  %v6277_v23 = vld [vmem:[#allocation10 + $0x758] ss:$24 sps:$4 sm:$0xff]   ;;  %v6291_v26 = vld [vmem:[#allocation10 + $0x6fc] ss:$24 sps:$4 sm:$0xff]   ;;  %v6297_v28 = vld [vmem:[#allocation10 + $0x6cc] ss:$24 sps:$4 sm:$0xff]  }
 0x1ee   :  { %v2298_v40 = vmul.f32 %v2292_v29, %v2286_v7  ;;  %4180 = vmatpush2.bf16.msra.mxu1 %v6364_v35  ;;  %v6960_v43 = vpack.c.bf16 %v2297_v39, %v2297_v39  ;;  %v6289_v27 = vld [vmem:[#allocation10 + $0x6f8] ss:$24 sps:$4 sm:$0xff]   ;;  %v6295_v29 = vld [vmem:[#allocation10 + $0x6c8] ss:$24 sps:$4 sm:$0xff]   ;;  %v6303_v33 = vld [vmem:[#allocation10 + $0x69c] ss:$24 sps:$4 sm:$0xff]  }
 0x1ef   :  { %4231 = vmatprep.subr.bf16.mxu1 %v6372_v41  ;;  %v6301_v34 = vld [vmem:[#allocation10 + $0x698] ss:$24 sps:$4 sm:$0xff]   ;;  %v6309_v35 = vld [vmem:[#allocation10 + $0x66c] ss:$24 sps:$4 sm:$0xff]   ;;  %v6307_v39 = vld [vmem:[#allocation10 + $0x668] ss:$24 sps:$4 sm:$0xff]  }
 0x1f0   :  { %v6958_v42 = vpack.c.bf16 %v2298_v40, %v2298_v40  ;;  %v6315_v7 = vld [vmem:[#allocation10 + $0x63c] ss:$24 sps:$4 sm:$0xff]   ;;  %v6313_v40 = vld [vmem:[#allocation10 + $0x638] ss:$24 sps:$4 sm:$0xff]   ;;  %v6321_v41 = vld [vmem:[#allocation10 + $0x60c] ss:$24 sps:$4 sm:$0xff]  }
 0x1f2   :  { %4140 = vmatprep.mubr.bf16.mxu0 %v6958_v42 }
 0x1f3   :  { %4141 = vmatmul.mubr.bf16.vlgmr.msra.gmra.mxu0 %v6960_v43 }
 0x1f4   :  { %4191 = vmatpush1.bf16.msra.mxu0 %v6226_v36  ;;  %4222 = vmatprep.mubr.bf16.mxu0 %v6942_v6  ;;  %v6319_v36 = vld [vmem:[#allocation10 + $0x608] ss:$24 sps:$4 sm:$0xff]  }
 0x1f5   :  { %4192 = vmatprep.subr.bf16.mxu0 %v6231_v44  ;;  %v6327_v44 = vld [vmem:[#allocation10 + $0x8dc] ss:$24 sps:$4 sm:$0xff]  }
 0x1f8   :  { %4193 = vmatpush1.bf16.msra.mxu0 %v6229_v45  ;;  %v6325_v45 = vld [vmem:[#allocation10 + $0x8d8] ss:$24 sps:$4 sm:$0xff]  }
 0x1f9   :  { %4194 = vmatprep.subr.bf16.mxu0 %v6234_v10  ;;  %v6333_v10 = vld [vmem:[#allocation10 + $0x8ac] ss:$24 sps:$4 sm:$0xff]  }
 0x1fc   :  { %4195 = vmatpush1.bf16.msra.mxu0 %v6232_v46  ;;  %v6331_v46 = vld [vmem:[#allocation10 + $0x8a8] ss:$24 sps:$4 sm:$0xff]  }
 0x1fd   :  { %4196 = vmatprep.subr.bf16.mxu0 %v6237_v47  ;;  %v6339_v47 = vld [vmem:[#allocation10 + $0x87c] ss:$24 sps:$4 sm:$0xff]  }
 0x200   :  { %4197 = vmatpush1.bf16.msra.mxu0 %v6235_v49  ;;  %v450_v49 = vsub.s32 4, %v6921_v25 }
 0x201   :  { %4198 = vmatprep.subr.bf16.mxu0 %v6240_v50  ;;  %v6337_v50 = vld [vmem:[#allocation10 + $0x878] ss:$24 sps:$4 sm:$0xff]  }
 0x204   :  { %4199 = vmatpush1.bf16.msra.mxu0 %v6238_v51  ;;  %v454_v51 = vsub.s32 5, %v6921_v25 }
 0x205   :  { %4200 = vmatprep.subr.bf16.mxu0 %v6243_v53  ;;  %v6345_v53 = vld [vmem:[#allocation10 + $0x84c] ss:$24 sps:$4 sm:$0xff]  }
 0x208   :  { %4201 = vmatpush1.bf16.msra.mxu0 %v6241_v32  ;;  %v451_v32 = vrot.slane %v6923_v30, %v450_v49 }
 0x209   :  { %4202 = vmatprep.subr.bf16.mxu0 %v6246_v54  ;;  %v6343_v54 = vld [vmem:[#allocation10 + $0x848] ss:$24 sps:$4 sm:$0xff]  }
 0x20c   :  { %4203 = vmatpush1.bf16.msra.mxu0 %v6244_v55  ;;  %v455_v55 = vrot.slane %v6923_v30, %v454_v51  ;;  %v6363_v30 = vld [vmem:[#allocation10 + $0x7bc] ss:$24 sps:$4 sm:$0xff]  }
 0x20d   :  { %4204 = vmatprep.subr.bf16.mxu0 %v6249_v48  ;;  %v6351_v48 = vld [vmem:[#allocation10 + $0x81c] ss:$24 sps:$4 sm:$0xff]  }
 0x210   :  { %4205 = vmatpush1.bf16.msra.mxu0 %v6247_v57 }
 0x211   :  { %4206 = vmatprep.subr.bf16.mxu0 %v6252_v37  ;;  %v6349_v37 = vld [vmem:[#allocation10 + $0x818] ss:$24 sps:$4 sm:$0xff]  }
 0x214   :  { %4207 = vmatpush2.bf16.msra.mxu0 %v6250_v60 }
 0x215   :  { %4208 = vmatprep.subr.bf16.mxu0 %v6255_v52  ;;  %v6357_v52 = vld [vmem:[#allocation10 + $0x7ec] ss:$24 sps:$4 sm:$0xff]  }
 0x218   :  { %4209 = vmatpush2.bf16.msra.mxu0 %v6253_v61 }
 0x219   :  { %4210 = vmatprep.subr.bf16.mxu0 %v6258_v62 }
 0x21c   :  { %4211 = vmatpush2.bf16.msra.mxu0 %v6256_v63  ;;  %v6355_v63 = vld [vmem:[#allocation10 + $0x7e8] ss:$24 sps:$4 sm:$0xff]  }
 0x21d   :  { %4212 = vmatprep.subr.bf16.mxu0 %v6261_v0 }
 0x220   :  { %4213 = vmatpush2.bf16.msra.mxu0 %v6259_v1 }
 0x221   :  { %4214 = vmatprep.subr.bf16.mxu0 %v6264_v2 }
 0x224   :  { %4215 = vmatpush2.bf16.msra.mxu0 %v6262_v3  ;;  %v6965_v5 = vpop.f32.mrf.mxu0 }
 0x225   :  { %4216 = vmatprep.subr.bf16.mxu0 %v6267_v4  ;;  %v2183_v57 = vadd.f32 %v6965_v5, %v451_v32  ;;  %v2293_v5 = vld [vmem:[#allocation5 + $0x20] sm:$0xff]  ;;  %v6397_v32 = vld [vmem:[#allocation10 + $0x3a0] ss:$24 sps:$4 sm:$0xff]  }
 0x226   :  { %v6967_v12 = vpop.f32.mrf.mxu0  ;;  %v6969_v13 = vpop.f32.mrf.mxu1 }
 0x227   :  { %v2185_v60 = vadd.f32 %v6967_v12, %v455_v55  ;;  %v2224_v61 = vadd.f32 %v6969_v13, %v2183_v57  ;;  %v6369_v13 = vld [vmem:[#allocation10 + $0x78c] ss:$24 sps:$4 sm:$0xff]   ;;  %v6400_v55 = vld [vmem:[#allocation10 + $0x368] ss:$24 sps:$4 sm:$0xff]  }
 0x228   :  { %4217 = vmatpush2.bf16.msra.mxu0 %v6265_v9  ;;  %v2186_v14 = vpop.f32.mrf.mxu0  ;;  %v6971_v15 = vpop.f32.mrf.mxu1  ;;  %v6403_v57 = vld [vmem:[#allocation10 + $0x370] ss:$24 sps:$4 sm:$0xff]  }
 0x229   :  { %4218 = vmatprep.subr.bf16.mxu0 %v6270_v11  ;;  %v2226_v0 = vadd.f32 %v6971_v15, %v2185_v60  ;;  %v6361_v11 = vld [vmem:[#allocation10 + $0x7b8] ss:$24 sps:$4 sm:$0xff]  }
 0x22a   :  { %v2187_v19 = vpop.f32.mrf.mxu0  ;;  %v2227_v20 = vpop.f32.mrf.mxu1  ;;  %v6406_v60 = vld [vmem:[#allocation10 + $0x338] ss:$24 sps:$4 sm:$0xff]  }
 0x22b   :  { %v6367_v20 = vld [vmem:[#allocation10 + $0x788] ss:$24 sps:$4 sm:$0xff]  }
 0x22c   :  { %4219 = vmatpush2.bf16.msra.mxu0 %v6268_v17  ;;  %v2228_v56 = vpop.f32.mrf.mxu1  ;;  %v2294_v17 = vld [vmem:[#allocation5 + $0x28] sm:$0xff] }
 0x22d   :  { %4220 = vmatprep.subr.bf16.mxu0 %v6273_v18 }
 0x230   :  { %4221 = vmatpush2.bf16.msra.mxu0 %v6271_v21 }
 0x231   :  { %4272 = vmatprep.subr.bf16.mxu0 %v6279_v22  ;;  %v6370_v22 = vld [vmem:[#allocation10 + $0x458] ss:$24 sps:$4 sm:$0xff]  }
 0x233   :  { %4223 = vmatmul.mubr.bf16.vlgmr.msra.gmra.mxu0 %v6944_v8 }
 0x234   :  { %4273 = vmatpush1.bf16.msra.mxu0 %v6277_v23 }
 0x235   :  { %4274 = vmatprep.subr.bf16.mxu0 %v6285_v59  ;;  %v6375_v59 = vld [vmem:[#allocation10 + $0x464] ss:$24 sps:$4 sm:$0xff]  }
 0x238   :  { %4275 = vmatpush1.bf16.msra.mxu0 %v6283_v24  ;;  %v6373_v24 = vld [vmem:[#allocation10 + $0x460] ss:$24 sps:$4 sm:$0xff]  }
 0x239   :  { %4276 = vmatprep.subr.bf16.mxu0 %v6291_v26 }
 0x23c   :  { %4277 = vmatpush1.bf16.msra.mxu0 %v6289_v27  ;;  %v6378_v27 = vld [vmem:[#allocation10 + $0x42c] ss:$24 sps:$4 sm:$0xff]  }
 0x23d   :  { %4278 = vmatprep.subr.bf16.mxu0 %v6297_v28  ;;  %v6381_v28 = vld [vmem:[#allocation10 + $0x434] ss:$24 sps:$4 sm:$0xff]  }
 0x240   :  { %4279 = vmatpush1.bf16.msra.mxu0 %v6295_v29  ;;  %v6376_v29 = vld [vmem:[#allocation10 + $0x428] ss:$24 sps:$4 sm:$0xff]  }
 0x241   :  { %4280 = vmatprep.subr.bf16.mxu0 %v6303_v33 }
 0x244   :  { %4281 = vmatpush1.bf16.msra.mxu0 %v6301_v34  ;;  %v6384_v34 = vld [vmem:[#allocation10 + $0x3fc] ss:$24 sps:$4 sm:$0xff]  }
 0x245   :  { %4282 = vmatprep.subr.bf16.mxu0 %v6309_v35  ;;  %v6379_v35 = vld [vmem:[#allocation10 + $0x430] ss:$24 sps:$4 sm:$0xff]  }
 0x248   :  { %4283 = vmatpush1.bf16.msra.mxu0 %v6307_v39 }
 0x249   :  { %4284 = vmatprep.subr.bf16.mxu0 %v6315_v7  ;;  %v6387_v7 = vld [vmem:[#allocation10 + $0x404] ss:$24 sps:$4 sm:$0xff]  }
 0x24c   :  { %4285 = vmatpush1.bf16.msra.mxu0 %v6313_v40  ;;  %v6382_v40 = vld [vmem:[#allocation10 + $0x3f8] ss:$24 sps:$4 sm:$0xff]  }
 0x24d   :  { %4286 = vmatprep.subr.bf16.mxu0 %v6321_v41 }
 0x250   :  { %4287 = vmatpush1.bf16.msra.mxu0 %v6319_v36  ;;  %v6390_v36 = vld [vmem:[#allocation10 + $0x3cc] ss:$24 sps:$4 sm:$0xff]  }
 0x251   :  { %4288 = vmatprep.subr.bf16.mxu0 %v6327_v44  ;;  %v6385_v44 = vld [vmem:[#allocation10 + $0x400] ss:$24 sps:$4 sm:$0xff]  }
 0x254   :  { %4289 = vmatpush2.bf16.msra.mxu0 %v6325_v45  ;;  %v6393_v45 = vld [vmem:[#allocation10 + $0x3d4] ss:$24 sps:$4 sm:$0xff]  }
 0x255   :  { %4290 = vmatprep.subr.bf16.mxu0 %v6333_v10  ;;  %v6388_v10 = vld [vmem:[#allocation10 + $0x3c8] ss:$24 sps:$4 sm:$0xff]  }
 0x258   :  { %4291 = vmatpush2.bf16.msra.mxu0 %v6331_v46  ;;  %v6396_v46 = vld [vmem:[#allocation10 + $0x39c] ss:$24 sps:$4 sm:$0xff]  }
 0x259   :  { %4292 = vmatprep.subr.bf16.mxu0 %v6339_v47  ;;  %v6399_v47 = vld [vmem:[#allocation10 + $0x3a4] ss:$24 sps:$4 sm:$0xff]  }
 0x25c   :  { %4293 = vmatpush2.bf16.msra.mxu0 %v6337_v50  ;;  %v6394_v50 = vld [vmem:[#allocation10 + $0x398] ss:$24 sps:$4 sm:$0xff]  }
 0x25d   :  { %4294 = vmatprep.subr.bf16.mxu0 %v6345_v53  ;;  %v6402_v53 = vld [vmem:[#allocation10 + $0x36c] ss:$24 sps:$4 sm:$0xff]  }
 0x260   :  { %4295 = vmatpush2.bf16.msra.mxu0 %v6343_v54  ;;  %v6405_v54 = vld [vmem:[#allocation10 + $0x374] ss:$24 sps:$4 sm:$0xff]  }
 0x261   :  { %4296 = vmatprep.subr.bf16.mxu0 %v6351_v48  ;;  %v6408_v48 = vld [vmem:[#allocation10 + $0x33c] ss:$24 sps:$4 sm:$0xff]  }
 0x264   :  { %4297 = vmatpush2.bf16.msra.mxu0 %v6349_v37  ;;  %v2264_v62 = vpop.f32.mrf.mxu0  ;;  %v6411_v37 = vld [vmem:[#allocation10 + $0x344] ss:$24 sps:$4 sm:$0xff]  }
 0x265   :  { %v2265_v1 = vadd.f32 %v2264_v62, %v2224_v61  ;;  %4298 = vmatprep.subr.bf16.mxu0 %v6357_v52  ;;  %v6414_v52 = vld [vmem:[#allocation10 + $0x30c] ss:$24 sps:$4 sm:$0xff]   ;;  %v6409_v61 = vld [vmem:[#allocation10 + $0x340] ss:$24 sps:$4 sm:$0xff]  }
 0x266   :  { %v2266_v2 = vpop.f32.mrf.mxu0  ;;  %v6417_v62 = vld [vmem:[#allocation10 + $0x314] ss:$24 sps:$4 sm:$0xff]  }
 0x267   :  { %vm2275_vm4 = vcmp.ge.f32.partialorder %v2265_v1, 0.0  ;;  %v2281_v3 = vmul.f32 0.01, %v2265_v1  ;;  %v2267_v4 = vadd.f32 %v2266_v2, %v2226_v0  ;;  %v6420_v0 = vld [vmem:[#allocation10 + $0x5dc] ss:$24 sps:$4 sm:$0xff]  }
 0x268   :  { %4299 = vmatpush2.bf16.msra.mxu0 %v6355_v63  ;;  %v2268_v9 = vpop.f32.mrf.mxu0  ;;  %v6412_v63 = vld [vmem:[#allocation10 + $0x308] ss:$24 sps:$4 sm:$0xff]   ;;  %v6418_v2 = vld [vmem:[#allocation10 + $0x5d8] ss:$24 sps:$4 sm:$0xff]  }
 0x269   :  { %v2287_v12 = vsel %vm2275_vm4, %v2265_v1, %v2281_v3  ;;  %vm2276_vm5 = vcmp.ge.f32.partialorder %v2267_v4, 0.0  ;;  %v2282_v14 = vmul.f32 0.01, %v2267_v4  ;;  %4300 = vmatprep.subr.bf16.mxu0 %v6363_v30  ;;  %v6415_v1 = vld [vmem:[#allocation10 + $0x310] ss:$24 sps:$4 sm:$0xff]  }
 0x26a   :  { %v2269_v18 = vpop.f32.mrf.mxu0  ;;  %v2299_v19 = vmul.f32 %v2293_v5, %v2287_v12  ;;  %v6423_v30 = vld [vmem:[#allocation10 + $0x5e4] ss:$24 sps:$4 sm:$0xff]   ;;  %v6429_v5 = vld [vmem:[#allocation10 + $0x5b4] ss:$24 sps:$4 sm:$0xff]   ;;  %v6424_v9 = vld [vmem:[#allocation10 + $0x5a8] ss:$24 sps:$4 sm:$0xff]  }
 0x26b   :  { %v2288_v15 = vsel %vm2276_vm5, %v2267_v4, %v2282_v14  ;;  %v6426_v3 = vld [vmem:[#allocation10 + $0x5ac] ss:$24 sps:$4 sm:$0xff]   ;;  %v6421_v4 = vld [vmem:[#allocation10 + $0x5e0] ss:$24 sps:$4 sm:$0xff]   ;;  %v6427_v12 = vld [vmem:[#allocation10 + $0x5b0] ss:$24 sps:$4 sm:$0xff]  }
 0x26c   :  { %4301 = vmatpush2.bf16.msra.mxu0 %v6361_v11  ;;  %v2300_v21 = vmul.f32 %v2294_v17, %v2288_v15  ;;  %v6988_v23 = vpack.c.bf16 %v2299_v19, %v2299_v19  ;;  %v6432_v11 = vld [vmem:[#allocation10 + $0x57c] ss:$24 sps:$4 sm:$0xff]   ;;  %v6438_v17 = vld [vmem:[#allocation10 + $0x54c] ss:$24 sps:$4 sm:$0xff]   ;;  %v6433_v18 = vld [vmem:[#allocation10 + $0x580] ss:$24 sps:$4 sm:$0xff]  }
 0x26d   :  { %4302 = vmatprep.subr.bf16.mxu0 %v6369_v13  ;;  %v6435_v14 = vld [vmem:[#allocation10 + $0x584] ss:$24 sps:$4 sm:$0xff]   ;;  %v6430_v13 = vld [vmem:[#allocation10 + $0x578] ss:$24 sps:$4 sm:$0xff]   ;;  %v6441_v19 = vld [vmem:[#allocation10 + $0x554] ss:$24 sps:$4 sm:$0xff]  }
 0x26e   :  { %v6986_v56 = vpack.c.bf16 %v2300_v21, %v2300_v21  ;;  %v6436_v15 = vld [vmem:[#allocation10 + $0x548] ss:$24 sps:$4 sm:$0xff]  }
 0x26f   :  { %v6439_v21 = vld [vmem:[#allocation10 + $0x550] ss:$24 sps:$4 sm:$0xff]  }
 0x270   :  { %4303 = vmatpush2.bf16.msra.mxu0 %v6367_v20  ;;  %4181 = vmatprep.mubr.bf16.mxu1 %v6986_v56  ;;  %v6444_v20 = vld [vmem:[#allocation10 + $0x51c] ss:$24 sps:$4 sm:$0xff]  }
 0x271   :  { %4304 = vmatprep.mubr.bf16.mxu0 %v6986_v56  ;;  %v6992_v26 = vpop.f32.mrf.mxu1  ;;  %4182 = vmatmul.mubr.bf16.vlgmr.msra.gmra.mxu1 %v6988_v23 }
 0x272   :  { %4232 = vmatpush1.bf16.msra.mxu1 %v6370_v22  ;;  %4263 = vmatprep.mubr.bf16.mxu1 %v6958_v42  ;;  %v6447_v22 = vld [vmem:[#allocation10 + $0x524] ss:$24 sps:$4 sm:$0xff]  }
 0x273   :  { %4305 = vmatmul.mubr.bf16.vlgmr.msra.gmra.mxu0 %v6988_v23  ;;  %4354 = vmatprep.subr.bf16.mxu0 %v6375_v59  ;;  %v6997_v33 = vpop.f32.mrf.mxu1  ;;  %v6442_v59 = vld [vmem:[#allocation10 + $0x518] ss:$24 sps:$4 sm:$0xff]  }
 0x274   :  { %4355 = vmatpush1.bf16.msra.mxu0 %v6373_v24  ;;  %4386 = vmatprep.mubr.bf16.mxu0 %v6958_v42  ;;  %v6391_v42 = vld [vmem:[#allocation10 + $0x3d0] ss:$24 sps:$4 sm:$0xff]   ;;  %v6450_v24 = vld [vmem:[#allocation10 + $0x4ec] ss:$24 sps:$4 sm:$0xff]  }
 0x275   :  { %4233 = vmatprep.subr.bf16.mxu1 %v6378_v27  ;;  %v4105_v39 = vpop.f32.mrf.mxu1  ;;  %4356 = vmatprep.subr.bf16.mxu0 %v6381_v28  ;;  %v6445_v27 = vld [vmem:[#allocation10 + $0x520] ss:$24 sps:$4 sm:$0xff]   ;;  %v6453_v28 = vld [vmem:[#allocation10 + $0x4f4] ss:$24 sps:$4 sm:$0xff]  }
 0x276   :  { %4234 = vmatpush1.bf16.msra.mxu1 %v6376_v29  ;;  %v6448_v29 = vld [vmem:[#allocation10 + $0x4e8] ss:$24 sps:$4 sm:$0xff]   ;;  %v6459_v39 = vld [vmem:[#allocation10 + $0x4c4] ss:$24 sps:$4 sm:$0xff]  }
 0x277   :  { %v4106_v41 = vpop.f32.mrf.mxu1  ;;  %4235 = vmatprep.subr.bf16.mxu1 %v6384_v34  ;;  %v6456_v34 = vld [vmem:[#allocation10 + $0x4bc] ss:$24 sps:$4 sm:$0xff]  }
 0x278   :  { %4357 = vmatpush1.bf16.msra.mxu0 %v6379_v35  ;;  %v6451_v35 = vld [vmem:[#allocation10 + $0x4f0] ss:$24 sps:$4 sm:$0xff]   ;;  %v6457_v41 = vld [vmem:[#allocation10 + $0x4c0] ss:$24 sps:$4 sm:$0xff]  }
 0x279   :  { %4358 = vmatprep.subr.bf16.mxu0 %v6387_v7  ;;  %v6454_v7 = vld [vmem:[#allocation10 + $0x4b8] ss:$24 sps:$4 sm:$0xff]  }
 0x27a   :  { %4236 = vmatpush1.bf16.msra.mxu1 %v6382_v40  ;;  %v6462_v40 = vld [vmem:[#allocation10 + $0x48c] ss:$24 sps:$4 sm:$0xff]  }
 0x27b   :  { %4237 = vmatprep.subr.bf16.mxu1 %v6390_v36  ;;  %v6465_v36 = vld [vmem:[#allocation10 + $0x494] ss:$24 sps:$4 sm:$0xff]  }
 0x27c   :  { %4359 = vmatpush1.bf16.msra.mxu0 %v6385_v44  ;;  %v6460_v44 = vld [vmem:[#allocation10 + $0x488] ss:$24 sps:$4 sm:$0xff]  }
 0x27d   :  { %4360 = vmatprep.subr.bf16.mxu0 %v6393_v45  ;;  %v7000_v45 = vld [vmem:[#allocation11] sm:$0x3f] }
 0x27e   :  { %4238 = vmatpush1.bf16.msra.mxu1 %v6388_v10  ;;  %v6468_v10 = vld [vmem:[#allocation10 + $0x164] ss:$24 sps:$4 sm:$0xff]  }
 0x27f   :  { %4239 = vmatprep.subr.bf16.mxu1 %v6396_v46  ;;  %v6463_v46 = vld [vmem:[#allocation10 + $0x490] ss:$24 sps:$4 sm:$0xff]  }
 0x280   :  { %4361 = vmatpush1.bf16.msra.mxu0 %v6391_v42  ;;  %v6550_v42 = vld [vmem:[#allocation13 + $0x78] sm:$0xff]  }
 0x281   :  { %4362 = vmatprep.subr.bf16.mxu0 %v6399_v47  ;;  %v2600_v47 = vrot.slane %v7000_v45, %v434_v31  ;;  %v6469_v31 = vld [vmem:[#allocation10 + $0x130] ss:$24 sps:$4 sm:$0xff]  }
 0x282   :  { %4240 = vmatpush1.bf16.msra.mxu1 %v6394_v50  ;;  %v6466_v50 = vld [vmem:[#allocation10 + $0x160] ss:$24 sps:$4 sm:$0xff]  }
 0x283   :  { %4241 = vmatprep.subr.bf16.mxu1 %v6402_v53  ;;  %v6471_v53 = vld [vmem:[#allocation10 + $0x134] ss:$24 sps:$4 sm:$0xff]  }
 0x284   :  { %4363 = vmatpush1.bf16.msra.mxu0 %v6397_v32  ;;  %v2604_v32 = vrot.slane %v7000_v45, %v438_v38 }
 0x285   :  { %4364 = vmatprep.subr.bf16.mxu0 %v6405_v54  ;;  %v6551_v54 = vld [vmem:[#allocation13 + $0x38] sm:$0xff]  }
 0x286   :  { %4242 = vmatpush1.bf16.msra.mxu1 %v6400_v55  ;;  %v6555_v55 = vld [vmem:[#allocation13 + $0x70] sm:$0xff]  }
 0x287   :  { %4243 = vmatprep.subr.bf16.mxu1 %v6408_v48  ;;  %v4102_v48 = vadd.f32 %v6992_v26, %v2600_v47  ;;  %v6472_v26 = vld [vmem:[#allocation10 + $0x100] ss:$24 sps:$4 sm:$0xff]   ;;  %v6511_v47 = vld [vmem:[#allocation10 + $0x190] ss:$24 sps:$4 sm:$0xff]  }
 0x288   :  { %4365 = vmatpush1.bf16.msra.mxu0 %v6403_v57 }
 0x289   :  { %4366 = vmatprep.subr.bf16.mxu0 %v6411_v37  ;;  %v6474_v37 = vld [vmem:[#allocation10 + $0x104] ss:$24 sps:$4 sm:$0xff]  }
 0x28a   :  { %4244 = vmatpush1.bf16.msra.mxu1 %v6406_v60  ;;  %v4104_v60 = vadd.f32 %v6997_v33, %v2604_v32  ;;  %v6475_v33 = vld [vmem:[#allocation10 + $0xd0] ss:$24 sps:$4 sm:$0xff]   ;;  %v6519_v32 = vld [vmem:[#allocation10 + $0x734] ss:$24 sps:$4 sm:$0xff]  }
 0x28b   :  { %4245 = vmatprep.subr.bf16.mxu1 %v6414_v52  ;;  %v6556_v52 = vld [vmem:[#allocation13 + $0x30] sm:$0xff]  }
 0x28c   :  { %4367 = vmatpush1.bf16.msra.mxu0 %v6409_v61 }
 0x28d   :  { %4368 = vmatprep.subr.bf16.mxu0 %v6417_v62  ;;  %v6560_v62 = vld [vmem:[#allocation13 + $0x68] sm:$0xff]  }
 0x28e   :  { %4246 = vmatpush1.bf16.msra.mxu1 %v6412_v63 }
 0x28f   :  { %4247 = vmatprep.subr.bf16.mxu1 %v6420_v0  ;;  %v6477_v0 = vld [vmem:[#allocation10 + $0xd4] ss:$24 sps:$4 sm:$0xff]  }
 0x290   :  { %4369 = vmatpush1.bf16.msra.mxu0 %v6415_v1 }
 0x291   :  { %4370 = vmatprep.subr.bf16.mxu0 %v6423_v30  ;;  %v6565_v30 = vld [vmem:[#allocation13 + $0x60] sm:$0xff]  }
 0x292   :  { %4248 = vmatpush2.bf16.msra.mxu1 %v6418_v2  ;;  %v6480_v2 = vld [vmem:[#allocation10 + $0xa4] ss:$24 sps:$4 sm:$0xff]  }
 0x293   :  { %4249 = vmatprep.subr.bf16.mxu1 %v6426_v3  ;;  %v6566_v3 = vld [vmem:[#allocation13 + $0x20] sm:$0xff]  }
 0x294   :  { %4371 = vmatpush2.bf16.msra.mxu0 %v6421_v4  ;;  %v6570_v4 = vld [vmem:[#allocation13 + $0x58] sm:$0xff]  }
 0x295   :  { %4372 = vmatprep.subr.bf16.mxu0 %v6429_v5  ;;  %v6478_v5 = vld [vmem:[#allocation10 + $0xa0] ss:$24 sps:$4 sm:$0xff]  }
 0x296   :  { %4250 = vmatpush2.bf16.msra.mxu1 %v6424_v9  ;;  %v6483_v9 = vld [vmem:[#allocation10 + $0x74] ss:$24 sps:$4 sm:$0xff]  }
 0x297   :  { %4251 = vmatprep.subr.bf16.mxu1 %v6432_v11  ;;  %v6571_v11 = vld [vmem:[#allocation13 + $0x18] sm:$0xff]  }
 0x298   :  { %4373 = vmatpush2.bf16.msra.mxu0 %v6427_v12  ;;  %v6572_v12 = vld [vmem:[#allocation13 + $0x50] sm:$0xff]  }
 0x299   :  { %4374 = vmatprep.subr.bf16.mxu0 %v6435_v14  ;;  %v6481_v14 = vld [vmem:[#allocation10 + $0x70] ss:$24 sps:$4 sm:$0xff]  }
 0x29a   :  { %4252 = vmatpush2.bf16.msra.mxu1 %v6430_v13  ;;  %v6486_v13 = vld [vmem:[#allocation10 + $0x44] ss:$24 sps:$4 sm:$0xff]  }
 0x29b   :  { %4253 = vmatprep.subr.bf16.mxu1 %v6438_v17  ;;  %v6573_v17 = vld [vmem:[#allocation13 + $0x10] sm:$0xff]  }
 0x29c   :  { %4375 = vmatpush2.bf16.msra.mxu0 %v6433_v18  ;;  %v6574_v18 = vld [vmem:[#allocation13 + $0x48] sm:$0xff]  }
 0x29d   :  { %4376 = vmatprep.subr.bf16.mxu0 %v6441_v19  ;;  %v6484_v19 = vld [vmem:[#allocation10 + $0x40] ss:$24 sps:$4 sm:$0xff]  }
 0x29e   :  { %4254 = vmatpush2.bf16.msra.mxu1 %v6436_v15  ;;  %v6489_v15 = vld [vmem:[#allocation10 + $0x14] ss:$24 sps:$4 sm:$0xff]  }
 0x29f   :  { %4255 = vmatprep.subr.bf16.mxu1 %v6444_v20  ;;  %v6575_v20 = vld [vmem:[#allocation13 + $0x8] sm:$0xff]  }
 0x2a0   :  { %4377 = vmatpush2.bf16.msra.mxu0 %v6439_v21  ;;  %v6576_v21 = vld [vmem:[#allocation13 + $0x40] sm:$0xff]  }
 0x2a1   :  { %4378 = vmatprep.subr.bf16.mxu0 %v6447_v22  ;;  %v6487_v22 = vld [vmem:[#allocation10 + $0x10] ss:$24 sps:$4 sm:$0xff]  }
 0x2a2   :  { %4256 = vmatpush2.bf16.msra.mxu1 %v6442_v59  ;;  %v6492_v59 = vld [vmem:[#allocation10 + $0x2e4] ss:$24 sps:$4 sm:$0xff]  }
 0x2a3   :  { %4257 = vmatprep.subr.bf16.mxu1 %v6450_v24  ;;  %v6577_v24 = vld [vmem:[#allocation13] sm:$0xff]  }
 0x2a4   :  { %4379 = vmatpush2.bf16.msra.mxu0 %v6445_v27  ;;  %v6490_v27 = vld [vmem:[#allocation10 + $0x2e0] ss:$24 sps:$4 sm:$0xff]  }
 0x2a5   :  { %4380 = vmatprep.subr.bf16.mxu0 %v6453_v28  ;;  %v6495_v28 = vld [vmem:[#allocation10 + $0x2b4] ss:$24 sps:$4 sm:$0xff]  }
 0x2a6   :  { %4258 = vmatpush2.bf16.msra.mxu1 %v6448_v29  ;;  %v6493_v29 = vld [vmem:[#allocation10 + $0x2b0] ss:$24 sps:$4 sm:$0xff]  }
 0x2a7   :  { %4259 = vmatprep.subr.bf16.mxu1 %v6456_v34  ;;  %v6498_v34 = vld [vmem:[#allocation10 + $0x284] ss:$24 sps:$4 sm:$0xff]  }
 0x2a8   :  { %4381 = vmatpush2.bf16.msra.mxu0 %v6451_v35  ;;  %v6496_v35 = vld [vmem:[#allocation10 + $0x280] ss:$24 sps:$4 sm:$0xff]  }
 0x2a9   :  { %4382 = vmatprep.subr.bf16.mxu0 %v6459_v39  ;;  %v6501_v39 = vld [vmem:[#allocation10 + $0x254] ss:$24 sps:$4 sm:$0xff]  }
 0x2aa   :  { %4260 = vmatpush2.bf16.msra.mxu1 %v6454_v7  ;;  %v6499_v7 = vld [vmem:[#allocation10 + $0x250] ss:$24 sps:$4 sm:$0xff]  }
 0x2ab   :  { %4261 = vmatprep.subr.bf16.mxu1 %v6462_v40  ;;  %v6504_v40 = vld [vmem:[#allocation10 + $0x224] ss:$24 sps:$4 sm:$0xff]  }
 0x2ac   :  { %4383 = vmatpush2.bf16.msra.mxu0 %v6457_v41  ;;  %v6502_v41 = vld [vmem:[#allocation10 + $0x220] ss:$24 sps:$4 sm:$0xff]  }
 0x2ad   :  { %4384 = vmatprep.subr.bf16.mxu0 %v6465_v36  ;;  %v6507_v36 = vld [vmem:[#allocation10 + $0x1f4] ss:$24 sps:$4 sm:$0xff]  }
 0x2ae   :  { %4262 = vmatpush2.bf16.msra.mxu1 %v6460_v44  ;;  %v6505_v44 = vld [vmem:[#allocation10 + $0x1f0] ss:$24 sps:$4 sm:$0xff]  }
 0x2af   :  { %4313 = vmatprep.subr.bf16.mxu1 %v6468_v10  ;;  %v6510_v10 = vld [vmem:[#allocation10 + $0x1c4] ss:$24 sps:$4 sm:$0xff]  }
 0x2b0   :  { %4385 = vmatpush2.bf16.msra.mxu0 %v6463_v46  ;;  %v6508_v46 = vld [vmem:[#allocation10 + $0x1c0] ss:$24 sps:$4 sm:$0xff]  }
 0x2b1   :  { %4264 = vmatmul.mubr.bf16.vlgmr.msra.gmra.mxu1 %v6960_v43  ;;  %5619 = vmatprep.subr.bf16.mxu0 %v6550_v42  ;;  %v6513_v42 = vld [vmem:[#allocation10 + $0x194] ss:$24 sps:$4 sm:$0xff]  }
 0x2b2   :  { %4314 = vmatpush1.bf16.msra.mxu1 %v6466_v50  ;;  %4345 = vmatprep.mubr.bf16.mxu1 %v6942_v6  ;;  %v6516_v50 = vld [vmem:[#allocation10 + $0x764] ss:$24 sps:$4 sm:$0xff]  }
 0x2b3   :  { %4387 = vmatmul.mubr.bf16.vlgmr.msra.gmra.mxu0 %v6960_v43  ;;  %v4142_v57 = vpop.f32.mrf.mxu0  ;;  %4315 = vmatprep.subr.bf16.mxu1 %v6471_v53  ;;  %v6561_v43 = vld [vmem:[#allocation13 + $0x28] sm:$0xff]   ;;  %v6514_v53 = vld [vmem:[#allocation10 + $0x760] ss:$24 sps:$4 sm:$0xff]  }
 0x2b4   :  { %v7013_v38 = vadd.f32 %v4142_v57, %v4102_v48  ;;  %5620 = vmatpush3.bf16.msra.mxu0 %v6551_v54  ;;  %v6517_v54 = vld [vmem:[#allocation10 + $0x730] ss:$24 sps:$4 sm:$0xff]   ;;  %v6522_v48 = vld [vmem:[#allocation10 + $0x704] ss:$24 sps:$4 sm:$0xff]   ;;  %v6520_v57 = vld [vmem:[#allocation10 + $0x700] ss:$24 sps:$4 sm:$0xff]  }
 0x2b5   :  { %v4144_v61 = vpop.f32.mrf.mxu0  ;;  %5621 = vmatprep.subr.bf16.mxu0 %v6555_v55 }
 0x2b6   :  { %v7015_v63 = vadd.f32 %v4144_v61, %v4104_v60  ;;  %4316 = vmatpush1.bf16.msra.mxu1 %v6469_v31  ;;  %v6525_v60 = vld [vmem:[#allocation10 + $0x6d4] ss:$24 sps:$4 sm:$0xff]   ;;  %v6523_v61 = vld [vmem:[#allocation10 + $0x6d0] ss:$24 sps:$4 sm:$0xff]  }
 0x2b7   :  { %v4146_v6 = vpop.f32.mrf.mxu0  ;;  %4317 = vmatprep.subr.bf16.mxu1 %v6474_v37 }
 0x2b8   :  { %5622 = vmatpush3.bf16.msra.mxu0 %v6556_v52  ;;  %v6534_v6 = vld [vmem:[#allocation10 + $0x644] ss:$24 sps:$4 sm:$0xff]  }
 0x2b9   :  { %v4147_v1 = vpop.f32.mrf.mxu0  ;;  %5623 = vmatprep.subr.bf16.mxu0 %v6560_v62  ;;  %v6526_v62 = vld [vmem:[#allocation10 + $0x6a0] ss:$24 sps:$4 sm:$0xff]  }
 0x2ba   :  { %4318 = vmatpush1.bf16.msra.mxu1 %v6472_v26  ;;  %v6529_v26 = vld [vmem:[#allocation10 + $0x670] ss:$24 sps:$4 sm:$0xff]  }
 0x2bb   :  { %4319 = vmatprep.subr.bf16.mxu1 %v6477_v0  ;;  %v6532_v0 = vld [vmem:[#allocation10 + $0x640] ss:$24 sps:$4 sm:$0xff]   ;;  %v6535_v1 = vld [vmem:[#allocation10 + $0x610] ss:$24 sps:$4 sm:$0xff]  }
 0x2bc   :  { %5624 = vmatpush3.bf16.msra.mxu0 %v6561_v43  ;;  %v6537_v43 = vld [vmem:[#allocation10 + $0x614] ss:$24 sps:$4 sm:$0xff]  }
 0x2bd   :  { %5625 = vmatprep.subr.bf16.mxu0 %v6565_v30  ;;  %v6540_v30 = vld [vmem:[#allocation10 + $0x8e4] ss:$24 sps:$4 sm:$0xff]  }
 0x2be   :  { %4320 = vmatpush1.bf16.msra.mxu1 %v6475_v33  ;;  %v6538_v33 = vld [vmem:[#allocation10 + $0x8e0] ss:$24 sps:$4 sm:$0xff]  }
 0x2bf   :  { %4321 = vmatprep.subr.bf16.mxu1 %v6480_v2  ;;  %v6543_v2 = vld [vmem:[#allocation10 + $0x8b4] ss:$24 sps:$4 sm:$0xff]  }
 0x2c0   :  { %5626 = vmatpush3.bf16.msra.mxu0 %v6566_v3  ;;  %v6541_v3 = vld [vmem:[#allocation10 + $0x8b0] ss:$24 sps:$4 sm:$0xff]  }
 0x2c1   :  { %5627 = vmatprep.subr.bf16.mxu0 %v6570_v4  ;;  %v6546_v4 = vld [vmem:[#allocation10 + $0x884] ss:$24 sps:$4 sm:$0xff]  }
 0x2c2   :  { %4322 = vmatpush1.bf16.msra.mxu1 %v6478_v5  ;;  %v6544_v5 = vld [vmem:[#allocation10 + $0x880] ss:$24 sps:$4 sm:$0xff]  }
 0x2c3   :  { %4323 = vmatprep.subr.bf16.mxu1 %v6483_v9  ;;  %v6549_v9 = vld [vmem:[#allocation10 + $0x854] ss:$24 sps:$4 sm:$0xff]  }
 0x2c4   :  { %5628 = vmatpush3.bf16.msra.mxu0 %v6571_v11  ;;  %v6547_v11 = vld [vmem:[#allocation10 + $0x850] ss:$24 sps:$4 sm:$0xff]  }
 0x2c5   :  { %5629 = vmatprep.subr.bf16.mxu0 %v6572_v12  ;;  %v6554_v12 = vld [vmem:[#allocation10 + $0x824] ss:$24 sps:$4 sm:$0xff]  }
 0x2c6   :  { %4324 = vmatpush1.bf16.msra.mxu1 %v6481_v14  ;;  %v6552_v14 = vld [vmem:[#allocation10 + $0x820] ss:$24 sps:$4 sm:$0xff]  }
 0x2c7   :  { %4325 = vmatprep.subr.bf16.mxu1 %v6486_v13  ;;  %v6559_v13 = vld [vmem:[#allocation10 + $0x7f4] ss:$24 sps:$4 sm:$0xff]  }
 0x2c8   :  { %5630 = vmatpush3.bf16.msra.mxu0 %v6573_v17  ;;  %v6557_v17 = vld [vmem:[#allocation10 + $0x7f0] ss:$24 sps:$4 sm:$0xff]  }
 0x2c9   :  { %5631 = vmatprep.subr.bf16.mxu0 %v6574_v18  ;;  %v6564_v18 = vld [vmem:[#allocation10 + $0x7c4] ss:$24 sps:$4 sm:$0xff]  }
 0x2ca   :  { %4326 = vmatpush1.bf16.msra.mxu1 %v6484_v19  ;;  %v6562_v19 = vld [vmem:[#allocation10 + $0x7c0] ss:$24 sps:$4 sm:$0xff]  }
 0x2cb   :  { %4327 = vmatprep.subr.bf16.mxu1 %v6489_v15  ;;  %v6569_v15 = vld [vmem:[#allocation10 + $0x794] ss:$24 sps:$4 sm:$0xff]  }
 0x2cc   :  { %5632 = vmatpush3.bf16.msra.mxu0 %v6575_v20  ;;  %v6567_v20 = vld [vmem:[#allocation10 + $0x790] ss:$24 sps:$4 sm:$0xff]  }
 0x2cd   :  { %5633 = vmatprep.subr.bf16.mxu0 %v6576_v21  ;;  %v6578_v21 = vld [vmem:[#allocation13 + $0xf8] sm:$0xff]  }
 0x2ce   :  { %4328 = vmatpush1.bf16.msra.mxu1 %v6487_v22  ;;  %v6579_v22 = vld [vmem:[#allocation13 + $0xb8] sm:$0xff]  }
 0x2cf   :  { %4329 = vmatprep.subr.bf16.mxu1 %v6492_v59  ;;  %v6580_v59 = vld [vmem:[#allocation13 + $0xf0] sm:$0xff]  }
 0x2d0   :  { %5634 = vmatpush3.bf16.msra.mxu0 %v6577_v24 }
 0x2d2   :  { %4330 = vmatpush2.bf16.msra.mxu1 %v6490_v27 }
 0x2d3   :  { %4331 = vmatprep.subr.bf16.mxu1 %v6495_v28  ;;  %v6581_v28 = vld [vmem:[#allocation13 + $0xb0] sm:$0xff]  }
 0x2d6   :  { %4332 = vmatpush2.bf16.msra.mxu1 %v6493_v29 }
 0x2d7   :  { %4333 = vmatprep.subr.bf16.mxu1 %v6498_v34 }
 0x2da   :  { %4334 = vmatpush2.bf16.msra.mxu1 %v6496_v35  ;;  %v6582_v35 = vld [vmem:[#allocation13 + $0xe8] sm:$0xff]  }
 0x2db   :  { %4335 = vmatprep.subr.bf16.mxu1 %v6501_v39 }
 0x2de   :  { %4336 = vmatpush2.bf16.msra.mxu1 %v6499_v7 }
 0x2df   :  { %4337 = vmatprep.subr.bf16.mxu1 %v6504_v40 }
 0x2e2   :  { %4338 = vmatpush2.bf16.msra.mxu1 %v6502_v41 }
 0x2e3   :  { %4339 = vmatprep.subr.bf16.mxu1 %v6507_v36 }
 0x2e6   :  { %4340 = vmatpush2.bf16.msra.mxu1 %v6505_v44 }
 0x2e7   :  { %4341 = vmatprep.subr.bf16.mxu1 %v6510_v10 }
 0x2ea   :  { %4342 = vmatpush2.bf16.msra.mxu1 %v6508_v46  ;;  %v6584_v46 = vld [vmem:[#allocation13 + $0xe0] sm:$0xff]  }
 0x2eb   :  { %4343 = vmatprep.subr.bf16.mxu1 %v6513_v42  ;;  %v6594_v42 = vld [vmem:[#allocation13 + $0x178] sm:$0xff]  }
 0x2ec   :  { %5663 = vmatprep.subr.bf16.mxu0 %v6594_v42 }
 0x2ee   :  { %4344 = vmatpush2.bf16.msra.mxu1 %v6511_v47 }
 0x2ef   :  { %4395 = vmatprep.subr.bf16.mxu1 %v6516_v50 }
 0x2f1   :  { %4346 = vmatmul.mubr.bf16.vlgmr.msra.gmra.mxu1 %v6944_v8  ;;  %v6528_v8 = vld [vmem:[#allocation10 + $0x6a4] ss:$24 sps:$4 sm:$0xff]  }
 0x2f2   :  { %4396 = vmatpush1.bf16.msra.mxu1 %v6514_v53  ;;  %4427 = vmatprep.mubr.bf16.mxu1 %v6986_v56  ;;  %v6531_v56 = vld [vmem:[#allocation10 + $0x674] ss:$24 sps:$4 sm:$0xff]  }
 0x2f3   :  { %v7019_v55 = vpop.f32.mrf.mxu0  ;;  %4397 = vmatprep.subr.bf16.mxu1 %v6519_v32  ;;  %v6595_v32 = vld [vmem:[#allocation13 + $0x138] sm:$0xff]  }
 0x2f5   :  { %v7021_v31 = vpop.f32.mrf.mxu0 }
 0x2f6   :  { %4398 = vmatpush1.bf16.msra.mxu1 %v6517_v54 }
 0x2f7   :  { %v4228_v37 = vpop.f32.mrf.mxu0  ;;  %4399 = vmatprep.subr.bf16.mxu1 %v6522_v48  ;;  %v6596_v48 = vld [vmem:[#allocation13 + $0x170] sm:$0xff]  }
 0x2f8   :  { %v6597_v37 = vld [vmem:[#allocation13 + $0x130] sm:$0xff]  }
 0x2f9   :  { %v4229_v52 = vpop.f32.mrf.mxu0 }
 0x2fa   :  { %4400 = vmatpush1.bf16.msra.mxu1 %v6520_v57  ;;  %v6586_v57 = vld [vmem:[#allocation13 + $0xd8] sm:$0xff]   ;;  %v6598_v52 = vld [vmem:[#allocation13 + $0x168] sm:$0xff]  }
 0x2fb   :  { %4401 = vmatprep.subr.bf16.mxu1 %v6525_v60  ;;  %v6587_v60 = vld [vmem:[#allocation13 + $0x98] sm:$0xff]  }
 0x2fe   :  { %4402 = vmatpush1.bf16.msra.mxu1 %v6523_v61  ;;  %v6588_v61 = vld [vmem:[#allocation13 + $0xd0] sm:$0xff]  }
 0x2ff   :  { %4403 = vmatprep.subr.bf16.mxu1 %v6528_v8  ;;  %v6599_v8 = vld [vmem:[#allocation13 + $0x128] sm:$0xff]  }
 0x302   :  { %4404 = vmatpush1.bf16.msra.mxu1 %v6526_v62  ;;  %v6589_v62 = vld [vmem:[#allocation13 + $0x90] sm:$0xff]  }
 0x303   :  { %4405 = vmatprep.subr.bf16.mxu1 %v6531_v56  ;;  %v6600_v56 = vld [vmem:[#allocation13 + $0x160] sm:$0xff]  }
 0x306   :  { %4406 = vmatpush1.bf16.msra.mxu1 %v6529_v26  ;;  %v6590_v26 = vld [vmem:[#allocation13 + $0xc8] sm:$0xff]  }
 0x307   :  { %4407 = vmatprep.subr.bf16.mxu1 %v6534_v6  ;;  %v6601_v6 = vld [vmem:[#allocation13 + $0x120] sm:$0xff]  }
 0x30a   :  { %4408 = vmatpush1.bf16.msra.mxu1 %v6532_v0  ;;  %v6591_v0 = vld [vmem:[#allocation13 + $0x88] sm:$0xff]  }
 0x30b   :  { %4409 = vmatprep.subr.bf16.mxu1 %v6537_v43  ;;  %v6602_v43 = vld [vmem:[#allocation13 + $0x158] sm:$0xff]  }
 0x30e   :  { %4410 = vmatpush1.bf16.msra.mxu1 %v6535_v1  ;;  %v6592_v1 = vld [vmem:[#allocation13 + $0xc0] sm:$0xff]  }
 0x30f   :  { %4411 = vmatprep.subr.bf16.mxu1 %v6540_v30  ;;  %v6603_v30 = vld [vmem:[#allocation13 + $0x118] sm:$0xff]  }
 0x312   :  { %4412 = vmatpush2.bf16.msra.mxu1 %v6538_v33  ;;  %v6593_v33 = vld [vmem:[#allocation13 + $0x80] sm:$0xff]  }
 0x313   :  { %4413 = vmatprep.subr.bf16.mxu1 %v6543_v2  ;;  %v6604_v2 = vld [vmem:[#allocation13 + $0x150] sm:$0xff]  }
 0x316   :  { %4414 = vmatpush2.bf16.msra.mxu1 %v6541_v3  ;;  %v2608_v3 = vrot.slane %v7000_v45, %v442_v58 }
 0x317   :  { %4415 = vmatprep.subr.bf16.mxu1 %v6546_v4  ;;  %v2612_v4 = vrot.slane %v7000_v45, %v446_v16 }
 0x31a   :  { %4416 = vmatpush2.bf16.msra.mxu1 %v6544_v5  ;;  %v6605_v5 = vld [vmem:[#allocation13 + $0x110] sm:$0xff]  }
 0x31b   :  { %4417 = vmatprep.subr.bf16.mxu1 %v6549_v9  ;;  %v4225_v9 = vadd.f32 %v7019_v55, %v2608_v3 }
 0x31e   :  { %4418 = vmatpush2.bf16.msra.mxu1 %v6547_v11 }
 0x31f   :  { %4419 = vmatprep.subr.bf16.mxu1 %v6554_v12  ;;  %v4227_v12 = vadd.f32 %v7021_v31, %v2612_v4  ;;  %v6609_v31 = vld [vmem:[#allocation13 + $0x100] sm:$0xff]  }
 0x322   :  { %4420 = vmatpush2.bf16.msra.mxu1 %v6552_v14 }
 0x323   :  { %4421 = vmatprep.subr.bf16.mxu1 %v6559_v13  ;;  %v6606_v13 = vld [vmem:[#allocation13 + $0x148] sm:$0xff]  }
 0x326   :  { %4422 = vmatpush2.bf16.msra.mxu1 %v6557_v17 }
 0x327   :  { %4423 = vmatprep.subr.bf16.mxu1 %v6564_v18 }
 0x32a   :  { %4424 = vmatpush2.bf16.msra.mxu1 %v6562_v19  ;;  %v6607_v19 = vld [vmem:[#allocation13 + $0x108] sm:$0xff]  }
 0x32b   :  { %4425 = vmatprep.subr.bf16.mxu1 %v6569_v15 }
 0x32e   :  { %4426 = vmatpush2.bf16.msra.mxu1 %v6567_v20 }
 0x32f   :  { %5641 = vmatprep.subr.bf16.mxu1 %v6578_v21 }
 0x331   :  { %4428 = vmatmul.mubr.bf16.vlgmr.msra.gmra.mxu1 %v6988_v23  ;;  %v4183_v24 = vpop.f32.mrf.mxu1  ;;  %v6583_v23 = vld [vmem:[#allocation13 + $0xa8] sm:$0xff]  }
 0x332   :  { %v4184_v27 = vadd.f32 %v4183_v24, %v7013_v38  ;;  %5642 = vmatpush3.bf16.msra.mxu1 %v6579_v22  ;;  %v6608_v22 = vld [vmem:[#allocation13 + $0x140] sm:$0xff]  }
 0x333   :  { %v7025_v29 = vpop.f32.mrf.mxu0  ;;  %v4185_v34 = vpop.f32.mrf.mxu1  ;;  %5643 = vmatprep.subr.bf16.mxu1 %v6580_v59 }
 0x334   :  { %vm4436_vm6 = vcmp.ge.f32.partialorder %v4184_v27, 0.0  ;;  %v4442_v39 = vmul.f32 0.01, %v4184_v27  ;;  %v4186_v7 = vadd.f32 %v4185_v34, %v7015_v63  ;;  %v6585_v63 = vld [vmem:[#allocation13 + $0xa0] sm:$0xff]  }
 0x335   :  { %v7028_v40 = vpop.f32.mrf.mxu0  ;;  %v4187_v41 = vpop.f32.mrf.mxu1 }
 0x336   :  { %vm4437_vm7 = vcmp.ge.f32.partialorder %v4186_v7, 0.0  ;;  %v4443_v36 = vmul.f32 0.01, %v4186_v7  ;;  %5644 = vmatpush3.bf16.msra.mxu1 %v6581_v28  ;;  %v4448_v44 = vsel %vm4436_vm6, %v4184_v27, %v4442_v39 }
 0x337   :  { %v4310_v38 = vpop.f32.mrf.mxu0  ;;  %v4188_v10 = vpop.f32.mrf.mxu1  ;;  %5645 = vmatprep.subr.bf16.mxu1 %v6582_v35  ;;  %v4454_v54 = vpack.c.bf16 %v4448_v44, %v4448_v44  ;;  %v2620_v44 = vrot.slane %v7000_v45, %v454_v51 }
 0x338   :  { %v4449_v47 = vsel %vm4437_vm7, %v4186_v7, %v4443_v36 }
 0x339   :  { %v4311_v50 = vpop.f32.mrf.mxu0  ;;  %v4455_v53 = vpack.c.bf16 %v4449_v47, %v4449_v47 }
 0x33a   :  { %5646 = vmatpush3.bf16.msra.mxu1 %v6583_v23 }
 0x33b   :  { %4883 = vmatprep.mubr.bf16.mxu0 %v4455_v53  ;;  %5647 = vmatprep.subr.bf16.mxu1 %v6584_v46 }
 0x33c   :  { %4884 = vmatmul.mubr.bf16.vlgmr.msra.gmra.mxu0 %v4454_v54 }
 0x33d   :  { %5664 = vmatpush3.bf16.msra.mxu0 %v6595_v32 }
 0x33e   :  { %5648 = vmatpush3.bf16.msra.mxu1 %v6585_v63  ;;  %5665 = vmatprep.subr.bf16.mxu0 %v6596_v48 }
 0x33f   :  { %5649 = vmatprep.subr.bf16.mxu1 %v6586_v57 }
 0x341   :  { %5666 = vmatpush3.bf16.msra.mxu0 %v6597_v37 }
 0x342   :  { %5650 = vmatpush3.bf16.msra.mxu1 %v6587_v60  ;;  %5667 = vmatprep.subr.bf16.mxu0 %v6598_v52 }
 0x343   :  { %5651 = vmatprep.subr.bf16.mxu1 %v6588_v61 }
 0x345   :  { %5668 = vmatpush3.bf16.msra.mxu0 %v6599_v8 }
 0x346   :  { %5652 = vmatpush3.bf16.msra.mxu1 %v6589_v62  ;;  %5669 = vmatprep.subr.bf16.mxu0 %v6600_v56  ;;  %v5570_v62 = vld [vmem:[#allocation14] ss:$0 sm:$0xff] }
 0x347   :  { %5653 = vmatprep.subr.bf16.mxu1 %v6590_v26 }
 0x349   :  { %5670 = vmatpush3.bf16.msra.mxu0 %v6601_v6 }
 0x34a   :  { %5654 = vmatpush3.bf16.msra.mxu1 %v6591_v0  ;;  %5671 = vmatprep.subr.bf16.mxu0 %v6602_v43 }
 0x34b   :  { %5655 = vmatprep.subr.bf16.mxu1 %v6592_v1 }
 0x34d   :  { %5672 = vmatpush3.bf16.msra.mxu0 %v6603_v30 }
 0x34e   :  { %5656 = vmatpush3.bf16.msra.mxu1 %v6593_v33  ;;  %5673 = vmatprep.subr.bf16.mxu0 %v6604_v2 }
 0x351   :  { %5674 = vmatpush3.bf16.msra.mxu0 %v6605_v5 }
 0x352   :  { %5675 = vmatprep.subr.bf16.mxu0 %v6606_v13 }
 0x355   :  { %5676 = vmatpush3.bf16.msra.mxu0 %v6607_v19 }
 0x356   :  { %5677 = vmatprep.subr.bf16.mxu0 %v6608_v22 }
 0x359   :  { %5678 = vmatpush3.bf16.msra.mxu0 %v6609_v31 }
 0x371   :  { %v4265_v11 = vpop.f32.mrf.mxu1 }
 0x372   :  { %v4266_v14 = vadd.f32 %v4265_v11, %v4225_v9 }
 0x373   :  { %v4267_v17 = vpop.f32.mrf.mxu1  ;;  %v4388_v18 = vpop.f32.mrf.mxu0 }
 0x374   :  { %v4307_v15 = vadd.f32 %v7025_v29, %v4266_v14  ;;  %v4268_v20 = vadd.f32 %v4267_v17, %v4227_v12 }
 0x375   :  { %v4269_v58 = vpop.f32.mrf.mxu1  ;;  %v4390_v21 = vpop.f32.mrf.mxu0 }
 0x376   :  { %vm4438_vm8 = vcmp.ge.f32.partialorder %v4307_v15, 0.0  ;;  %v4444_v16 = vmul.f32 0.01, %v4307_v15  ;;  %v4309_v55 = vadd.f32 %v7028_v40, %v4268_v20  ;;  %v2616_v40 = vrot.slane %v7000_v45, %v450_v49 }
 0x377   :  { %v4270_v59 = vpop.f32.mrf.mxu1  ;;  %v4392_v24 = vpop.f32.mrf.mxu0 }
 0x378   :  { %v4445_v27 = vmul.f32 0.01, %v4309_v55  ;;  %vm4439_vm9 = vcmp.ge.f32.partialorder %v4309_v55, 0.0  ;;  %v4450_v28 = vsel %vm4438_vm8, %v4307_v15, %v4444_v16 }
 0x379   :  { %v4393_v34 = vpop.f32.mrf.mxu0  ;;  %v4456_v39 = vpack.c.bf16 %v4450_v28, %v4450_v28 }
 0x37a   :  { %v4451_v29 = vsel %vm4439_vm9, %v4309_v55, %v4445_v27 }
 0x37b   :  { %v4457_v35 = vpack.c.bf16 %v4451_v29, %v4451_v29 }
 0x37d   :  { %4923 = vmatprep.mubr.bf16.mxu1 %v4457_v35 }
 0x37e   :  { %4924 = vmatmul.mubr.bf16.vlgmr.msra.gmra.mxu1 %v4456_v39 }
 0x3b1   :  { %v4347_v7 = vpop.f32.mrf.mxu1 }
 0x3b2   :  { %v4348_v38 = vadd.f32 %v4347_v7, %v2616_v40 }
 0x3b3   :  { %v4349_v41 = vpop.f32.mrf.mxu1 }
 0x3b4   :  { %v4350_v10 = vadd.f32 %v4349_v41, %v2620_v44  ;;  %v4389_v46 = vadd.f32 %v4388_v18, %v4348_v38 }
 0x3b5   :  { %v4351_v36 = vpop.f32.mrf.mxu1 }
 0x3b6   :  { %v4391_v50 = vadd.f32 %v4390_v21, %v4350_v10 }
 0x3b7   :  { %v4352_v23 = vpop.f32.mrf.mxu1 }
 0x3f1   :  { %v4429_v42 = vpop.f32.mrf.mxu1 }
 0x3f2   :  { %v4430_v47 = vadd.f32 %v4429_v42, %v4389_v46 }
 0x3f3   :  { %v4431_v53 = vpop.f32.mrf.mxu1 }
 0x3f4   :  { %vm4440_vm10 = vcmp.ge.f32.partialorder %v4430_v47, 0.0  ;;  %v4446_v32 = vmul.f32 0.01, %v4430_v47  ;;  %v4432_v54 = vadd.f32 %v4431_v53, %v4391_v50 }
 0x3f5   :  { %v4433_v63 = vpop.f32.mrf.mxu1 }
 0x3f6   :  { %vm4441_vm11 = vcmp.ge.f32.partialorder %v4432_v54, 0.0  ;;  %v4447_v48 = vmul.f32 0.01, %v4432_v54  ;;  %v4452_v57 = vsel %vm4440_vm10, %v4430_v47, %v4446_v32 }
 0x3f7   :  { %v4434_v37 = vpop.f32.mrf.mxu1  ;;  %v4458_v25 = vpack.c.bf16 %v4452_v57, %v4452_v57 }
 0x3f8   :  { %v4453_v49 = vsel %vm4441_vm11, %v4432_v54, %v4447_v48 }
 0x3f9   :  { %v4459_v60 = vpack.c.bf16 %v4453_v49, %v4453_v49 }
 0x3fb   :  { %4963 = vmatprep.mubr.bf16.mxu0 %v4459_v60 }
 0x3fc   :  { %4964 = vmatmul.mubr.bf16.vlgmr.msra.gmra.mxu0 %v4458_v25  ;;  %v5635_v51 = vpop.f32.mrf.mxu0 }
 0x3fe   :  { %v5636_v45 = vpop.f32.mrf.mxu0 }
 0x3ff   :  { %v5637_v52 = vadd.f32 %v5636_v45, %v5635_v51 }
 0x400   :  { %v5638_v61 = vpop.f32.mrf.mxu0 }
 0x401   :  { %v4886_v6 = vadd.f32 %v5637_v52, %v5570_v62 }
 0x402   :  { %v5639_v8 = vpop.f32.mrf.mxu0 }
 0x43e   :  { %v5657_v56 = vpop.f32.mrf.mxu1 }
 0x440   :  { %v5658_v26 = vpop.f32.mrf.mxu1 }
 0x441   :  { %v5659_v0 = vadd.f32 %v5658_v26, %v5657_v56 }
 0x442   :  { %v5660_v43 = vpop.f32.mrf.mxu1 }
 0x443   :  { %v4926_v1 = vadd.f32 %v5659_v0, %v4886_v6 }
 0x444   :  { %v5661_v30 = vpop.f32.mrf.mxu1 }
 0x4bc   :  { %v5679_v33 = vpop.f32.mrf.mxu0 }
 0x4be   :  { %v5680_v2 = vpop.f32.mrf.mxu0 }
 0x4bf   :  { %v5681_v3 = vadd.f32 %v5680_v2, %v5679_v33 }
 0x4c0   :  { %v5682_v4 = vpop.f32.mrf.mxu0 }
 0x4c1   :  { %v4966_v5 = vadd.f32 %v5681_v3, %v4926_v1 }
 0x4c2   :  { %v5683_v9 = vpop.f32.mrf.mxu0 }
 0x4c3   :  { %v4972_v11 = vmul.f32 0.01, %v4966_v5  ;;  %vm4971_vm12 = vcmp.ge.f32.partialorder %v4966_v5, 0.0 }
 0x4c5   :  { %v4973_v12 = vsel %vm4971_vm12, %v4966_v5, %v4972_v11 }
 0x4c6   :  { %4974 = vst [vmem:[#allocation16] sm:$0xff] %v4973_v12 }
 0x4c7   :  { %6781 = shalt.err (!%p6778_p2)
}
 0x4c8   :  { %4984 = dma.vmem_to_hbm [thread:$0]  %s4982_s7, 128, %s7057_s8, [#allocation4]  }
 0x4c9   :  { %6800 = dma.done.wait [#allocation4], 128  }
 0x4ca   :  { %6801 = vsyncadd [#allocation4], 4294967168 }
 0x4cb   :  { %4988 = vsyncpa [#allocation3], 1 }
 0x4cc   :  { %4989 = vsyncpa [#allocation6], 1 }
 0x4cd   :  { %4990 = vsyncpa [#allocation9], 1 }
 0x4ce   :  { %4991 = vsyncpa [#allocation12], 1 }
 0x4cf   :  { %4992 = vsyncpa [#allocation15], 1 }
 0x4d0   :  { %4993 = vsyncpa [#allocation4], 1 }

</bundles_post_ra>
